<compile_context>
chip_gen: v6e
topology: v6e:2x2x1
jax: 0.10.0
libtpu: 0.0.40
codegen_flags: <defaults>
</compile_context>

<pallas_src>
import math
import jax
import jax.numpy as jnp
from jax.experimental import pallas as pl
from jax.experimental.pallas import tpu as pltpu

D_MODEL = 32
N_HEADS = 4
D_HEAD = D_MODEL // N_HEADS
D_FF = 64
EPS = 1e-6


# --------------------------- fused Pallas kernel -----------------------------

def _make_encoder_layer_kernel(S, D, H, dk, eps):
    scale = 1.0 / math.sqrt(dk)

    def _layer_norm(h, g, b):
        mu = jnp.mean(h, axis=-1, keepdims=True)
        var = jnp.mean(jnp.square(h - mu), axis=-1, keepdims=True)
        return (h - mu) * jax.lax.rsqrt(var + eps) * g + b

    def kernel(x_ref, relq_ref, relv_ref, mask_ref,
               ln1g_ref, ln1b_ref, wqkv_ref, bqkv_ref, wo_ref, bo_ref,
               ln2g_ref, ln2b_ref, w1_ref, b1_ref, w2_ref, b2_ref,
               o_ref):
        x = x_ref[0]            # [S, D]      f32
        rel_q = relq_ref[0]     # [S, S, dk]  bf16
        rel_v = relv_ref[0]     # [S, S, dk]  bf16
        mask = mask_ref[0]      # [S, S]      f32 (1 = keep, 0 = masked)

        # Hoisted additive mask bias (computed once, shared by all heads).
        bias = jnp.where(mask > 0.0, 0.0, -1e9)                   # [S, S] f32

        # ---- sublayer 0: pre-norm relative self-attention + residual ----
        xn = _layer_norm(x, ln1g_ref[...], ln1b_ref[...])
        qkv = (jnp.dot(xn.astype(jnp.bfloat16), wqkv_ref[...],
                       preferred_element_type=jnp.float32)
               + bqkv_ref[...])                                   # [S, 3D] f32

        # Single reshape into head layout; 1/sqrt(dk) folded into q.
        q = (qkv[:, 0 * D:1 * D] * scale).reshape(S, H, dk).astype(jnp.bfloat16)
        k = qkv[:, 1 * D:2 * D].reshape(S, H, dk).astype(jnp.bfloat16)
        v = qkv[:, 2 * D:3 * D].reshape(S, H, dk).astype(jnp.bfloat16)

        # Content scores + Shaw relative-key scores, all heads in two batched
        # MXU contractions (batch over heads / over the query index).
        s = jnp.einsum('qhd,khd->hqk', q, k,
                       preferred_element_type=jnp.float32)        # [H, S, S]
        s = s + jnp.einsum('qhd,qkd->hqk', q, rel_q,
                           preferred_element_type=jnp.float32)
        s = s + bias[None, :, :]

        # Softmax in f32; divide goes to the EUP via approx reciprocal.
        m = jnp.max(s, axis=-1, keepdims=True)
        p = jnp.exp(s - m)
        p = p * pl.reciprocal(jnp.sum(p, axis=-1, keepdims=True), approx=True)
        pb = p.astype(jnp.bfloat16)

        # Attention output + relative-value contribution, all heads at once.
        o = jnp.einsum('hqk,khd->qhd', pb, v,
                       preferred_element_type=jnp.float32)        # [S, H, dk]
        o = o + jnp.einsum('hqk,qkd->qhd', pb, rel_v,
                           preferred_element_type=jnp.float32)
        attn = o.reshape(S, D)                                    # merge heads

        attn = (jnp.dot(attn.astype(jnp.bfloat16), wo_ref[...],
                        preferred_element_type=jnp.float32)
                + bo_ref[...])
        h1 = x + attn
        # TODO(synk): nn.Dropout in SublayerConnection is identity at inference; omitted.

        # ---- sublayer 1: pre-norm feed-forward + residual ----
        hn = _layer_norm(h1, ln2g_ref[...], ln2b_ref[...])
        f = (jnp.dot(hn.astype(jnp.bfloat16), w1_ref[...],
                     preferred_element_type=jnp.float32)
             + b1_ref[...])
        f = jnp.maximum(f, 0.0)
        f = (jnp.dot(f.astype(jnp.bfloat16), w2_ref[...],
                     preferred_element_type=jnp.float32)
             + b2_ref[...])
        o_ref[0] = h1 + f

    return kernel


def encoder_layer_forward(params, code, rel_q_emb, rel_v_emb, mask):
    """code: [B,S,D], rel_q_emb/rel_v_emb: [B,S,S,dk], mask: [B,S,S]."""
    B, S, D = code.shape
    dk = D // N_HEADS
    kernel = _make_encoder_layer_kernel(S, D, N_HEADS, dk, EPS)

    # bf16 copies of the MXU operands (halves HBM traffic / VMEM for the rel
    # tensors and weights); f32 is kept for LN params, biases, mask, residual.
    relq_bf = rel_q_emb.astype(jnp.bfloat16)
    relv_bf = rel_v_emb.astype(jnp.bfloat16)
    wqkv_bf = params["wqkv"].astype(jnp.bfloat16)
    wo_bf = params["wo"].astype(jnp.bfloat16)
    w1_bf = params["w1"].astype(jnp.bfloat16)
    w2_bf = params["w2"].astype(jnp.bfloat16)

    def shared(shape):
        nd = len(shape)
        return pl.BlockSpec(shape, lambda b, _nd=nd: (0,) * _nd)

    return pl.pallas_call(
        kernel,
        out_shape=jax.ShapeDtypeStruct((B, S, D), jnp.float32),
        grid=(B,),
        in_specs=[
            pl.BlockSpec((1, S, D), lambda b: (b, 0, 0)),          # code
            pl.BlockSpec((1, S, S, dk), lambda b: (b, 0, 0, 0)),   # rel_q_emb
            pl.BlockSpec((1, S, S, dk), lambda b: (b, 0, 0, 0)),   # rel_v_emb
            pl.BlockSpec((1, S, S), lambda b: (b, 0, 0)),          # mask
            shared((1, D)), shared((1, D)),                        # ln1 gamma/beta
            shared((D, 3 * D)), shared((1, 3 * D)),                # wqkv / bqkv
            shared((D, D)), shared((1, D)),                        # wo / bo
            shared((1, D)), shared((1, D)),                        # ln2 gamma/beta
            shared((D, D_FF)), shared((1, D_FF)),                  # w1 / b1
            shared((D_FF, D)), shared((1, D)),                     # w2 / b2
        ],
        out_specs=pl.BlockSpec((1, S, D), lambda b: (b, 0, 0)),
        compiler_params=pltpu.CompilerParams(
            dimension_semantics=("parallel",)),
    )(code, relq_bf, relv_bf, mask,
      params["ln1_g"], params["ln1_b"],
      wqkv_bf, params["bqkv"], wo_bf, params["bo"],
      params["ln2_g"], params["ln2_b"],
      w1_bf, params["b1"], w2_bf, params["b2"])


# --------------------------- pure-JAX reference -------------------------------

def encoder_layer_reference(params, code, rel_q, rel_v, mask):
    def ln(h, g, b):
        mu = jnp.mean(h, -1, keepdims=True)
        var = jnp.mean(jnp.square(h - mu), -1, keepdims=True)
        return (h - mu) / jnp.sqrt(var + EPS) * g + b

    B, S, D = code.shape
    H, dk = N_HEADS, D // N_HEADS
    xn = ln(code, params["ln1_g"], params["ln1_b"])
    qkv = xn @ params["wqkv"] + params["bqkv"]
    q, k, v = jnp.split(qkv, 3, axis=-1)

    def split_heads(t):
        return t.reshape(B, S, H, dk).transpose(0, 2, 1, 3)

    qh, kh, vh = map(split_heads, (q, k, v))
    scores = jnp.einsum('bhqd,bhkd->bhqk', qh, kh)
    scores = scores + jnp.einsum('bhqd,bqkd->bhqk', qh, rel_q)
    scores = scores / math.sqrt(dk)
    scores = jnp.where(mask[:, None] > 0.0, scores, -1e9)
    p = jax.nn.softmax(scores, axis=-1)
    out = (jnp.einsum('bhqk,bhkd->bhqd', p, vh)
           + jnp.einsum('bhqk,bqkd->bhqd', p, rel_v))
    out = out.transpose(0, 2, 1, 3).reshape(B, S, D)
    attn = out @ params["wo"] + params["bo"]
    h1 = code + attn
    hn = ln(h1, params["ln2_g"], params["ln2_b"])
    f = jnp.maximum(hn @ params["w1"] + params["b1"], 0.0) @ params["w2"] + params["b2"]
    return h1 + f


# --------------------------- deterministic init -------------------------------

def init_params(key):
    keys = jax.random.split(key, 8)

    def nrm(k, shape, scale=0.1):
        return scale * jax.random.normal(k, shape, dtype=jnp.float32)

    return {
        "ln1_g": jnp.ones((1, D_MODEL), jnp.float32),
        "ln1_b": jnp.zeros((1, D_MODEL), jnp.float32),
        "wqkv": nrm(keys[0], (D_MODEL, 3 * D_MODEL)),
        "bqkv": nrm(keys[1], (1, 3 * D_MODEL), 0.05),
        "wo": nrm(keys[2], (D_MODEL, D_MODEL)),
        "bo": nrm(keys[3], (1, D_MODEL), 0.05),
        "ln2_g": jnp.ones((1, D_MODEL), jnp.float32),
        "ln2_b": jnp.zeros((1, D_MODEL), jnp.float32),
        "w1": nrm(keys[4], (D_MODEL, D_FF)),
        "b1": nrm(keys[5], (1, D_FF), 0.05),
        "w2": nrm(keys[6], (D_FF, D_MODEL)),
        "b2": nrm(keys[7], (1, D_MODEL), 0.05),
    }


# --------------------------------- main ---------------------------------------

if __name__ == "__main__":
    B, S = 2, 16
    dk = D_MODEL // N_HEADS

    root = jax.random.PRNGKey(0)
    kin = jax.random.split(root, 4)
    code = jax.random.normal(kin[0], (B, S, D_MODEL), jnp.float32)
    rel_q_emb = 0.1 * jax.random.normal(kin[1], (B, S, S, dk), jnp.float32)
    rel_v_emb = 0.1 * jax.random.normal(kin[2], (B, S, S, dk), jnp.float32)

    lens = jnp.array([S, S - 5])
    key_mask = (jnp.arange(S)[None, :] < lens[:, None]).astype(jnp.float32)  # [B,S]
    mask = jnp.broadcast_to(key_mask[:, None, :], (B, S, S))                 # [B,S,S]

    params = init_params(jax.random.PRNGKey(42))

    fwd = jax.jit(encoder_layer_forward)
    out = fwd(params, code, rel_q_emb, rel_v_emb, mask)
    jax.block_until_ready(out)

    ref = encoder_layer_reference(params, code, rel_q_emb, rel_v_emb, mask)

    assert out.shape == (B, S, D_MODEL), out.shape
    assert bool(jnp.all(jnp.isfinite(out)))
    assert bool(jnp.allclose(out, ref, atol=5e-2, rtol=5e-2)), \
        float(jnp.max(jnp.abs(out - ref)))
    print("KERNEL_OK")
</pallas_src>

<mosaic_0001>
module attributes {stable_mosaic.version = 11 : i64} {
  func.func @kernel(%arg0: i32, %arg1: memref<1x16x32xf32, #tpu.memory_space<vmem>>, %arg2: memref<1x16x16x8xbf16, #tpu.memory_space<vmem>>, %arg3: memref<1x16x16x8xbf16, #tpu.memory_space<vmem>>, %arg4: memref<1x16x16xf32, #tpu.memory_space<vmem>>, %arg5: memref<1x32xf32, #tpu.memory_space<vmem>>, %arg6: memref<1x32xf32, #tpu.memory_space<vmem>>, %arg7: memref<32x96xbf16, #tpu.memory_space<vmem>>, %arg8: memref<1x96xf32, #tpu.memory_space<vmem>>, %arg9: memref<32x32xbf16, #tpu.memory_space<vmem>>, %arg10: memref<1x32xf32, #tpu.memory_space<vmem>>, %arg11: memref<1x32xf32, #tpu.memory_space<vmem>>, %arg12: memref<1x32xf32, #tpu.memory_space<vmem>>, %arg13: memref<32x64xbf16, #tpu.memory_space<vmem>>, %arg14: memref<1x64xf32, #tpu.memory_space<vmem>>, %arg15: memref<64x32xbf16, #tpu.memory_space<vmem>>, %arg16: memref<1x32xf32, #tpu.memory_space<vmem>>, %arg17: memref<1x16x32xf32, #tpu.memory_space<vmem>>) attributes {dimension_semantics = [#tpu.dimension_semantics<parallel>], iteration_bounds = array<i64: 2>, scalar_prefetch = 0 : i64, scratch_operands = 0 : i64, tpu.core_type = #tpu.core_type<tc>, window_params = [{transform_indices = @transform_0, window_bounds = array<i64: 1, 16, 32>}, {transform_indices = @transform_1, window_bounds = array<i64: 1, 16, 16, 8>}, {transform_indices = @transform_2, window_bounds = array<i64: 1, 16, 16, 8>}, {transform_indices = @transform_3, window_bounds = array<i64: 1, 16, 16>}, {pipeline_mode = #tpu.pipeline_mode<synchronous>, transform_indices = @transform_4, window_bounds = array<i64: 1, 32>}, {pipeline_mode = #tpu.pipeline_mode<synchronous>, transform_indices = @transform_5, window_bounds = array<i64: 1, 32>}, {pipeline_mode = #tpu.pipeline_mode<synchronous>, transform_indices = @transform_6, window_bounds = array<i64: 32, 96>}, {pipeline_mode = #tpu.pipeline_mode<synchronous>, transform_indices = @transform_7, window_bounds = array<i64: 1, 96>}, {pipeline_mode = #tpu.pipeline_mode<synchronous>, transform_indices = @transform_8, window_bounds = array<i64: 32, 32>}, {pipeline_mode = #tpu.pipeline_mode<synchronous>, transform_indices = @transform_9, window_bounds = array<i64: 1, 32>}, {pipeline_mode = #tpu.pipeline_mode<synchronous>, transform_indices = @transform_10, window_bounds = array<i64: 1, 32>}, {pipeline_mode = #tpu.pipeline_mode<synchronous>, transform_indices = @transform_11, window_bounds = array<i64: 1, 32>}, {pipeline_mode = #tpu.pipeline_mode<synchronous>, transform_indices = @transform_12, window_bounds = array<i64: 32, 64>}, {pipeline_mode = #tpu.pipeline_mode<synchronous>, transform_indices = @transform_13, window_bounds = array<i64: 1, 64>}, {pipeline_mode = #tpu.pipeline_mode<synchronous>, transform_indices = @transform_14, window_bounds = array<i64: 64, 32>}, {pipeline_mode = #tpu.pipeline_mode<synchronous>, transform_indices = @transform_15, window_bounds = array<i64: 1, 32>}, {transform_indices = @transform_16, window_bounds = array<i64: 1, 16, 32>}]} {
    %c0 = arith.constant 0 : index
    %c0_0 = arith.constant 0 : index
    %c0_1 = arith.constant 0 : index
    %0 = vector.load %arg1[%c0, %c0_0, %c0_1] : memref<1x16x32xf32, #tpu.memory_space<vmem>>, vector<1x16x32xf32>
    %1 = vector.shape_cast %0 : vector<1x16x32xf32> to vector<16x32xf32>
    %c0_2 = arith.constant 0 : index
    %c0_3 = arith.constant 0 : index
    %c0_4 = arith.constant 0 : index
    %c0_5 = arith.constant 0 : index
    %2 = vector.load %arg2[%c0_2, %c0_3, %c0_4, %c0_5] : memref<1x16x16x8xbf16, #tpu.memory_space<vmem>>, vector<1x16x16x8xbf16>
    %3 = vector.shape_cast %2 : vector<1x16x16x8xbf16> to vector<16x16x8xbf16>
    %c0_6 = arith.constant 0 : index
    %c0_7 = arith.constant 0 : index
    %c0_8 = arith.constant 0 : index
    %c0_9 = arith.constant 0 : index
    %4 = vector.load %arg3[%c0_6, %c0_7, %c0_8, %c0_9] : memref<1x16x16x8xbf16, #tpu.memory_space<vmem>>, vector<1x16x16x8xbf16>
    %5 = vector.shape_cast %4 : vector<1x16x16x8xbf16> to vector<16x16x8xbf16>
    %c0_10 = arith.constant 0 : index
    %c0_11 = arith.constant 0 : index
    %c0_12 = arith.constant 0 : index
    %6 = vector.load %arg4[%c0_10, %c0_11, %c0_12] : memref<1x16x16xf32, #tpu.memory_space<vmem>>, vector<1x16x16xf32>
    %7 = vector.shape_cast %6 : vector<1x16x16xf32> to vector<16x16xf32>
    %cst = arith.constant 0.000000e+00 : f32
    %8 = vector.broadcast %cst : f32 to vector<16x16xf32>
    %9 = arith.cmpf ogt, %7, %8 : vector<16x16xf32>
    %cst_13 = arith.constant 0.000000e+00 : f32
    %cst_14 = arith.constant -1.000000e+09 : f32
    %10 = vector.broadcast %cst_13 : f32 to vector<16x16xf32>
    %11 = vector.broadcast %cst_14 : f32 to vector<16x16xf32>
    %12 = arith.select %9, %10, %11 : vector<16x16xi1>, vector<16x16xf32>
    %c0_15 = arith.constant 0 : index
    %c0_16 = arith.constant 0 : index
    %13 = vector.load %arg5[%c0_15, %c0_16] : memref<1x32xf32, #tpu.memory_space<vmem>>, vector<1x32xf32>
    %c0_17 = arith.constant 0 : index
    %c0_18 = arith.constant 0 : index
    %14 = vector.load %arg6[%c0_17, %c0_18] : memref<1x32xf32, #tpu.memory_space<vmem>>, vector<1x32xf32>
    %cst_19 = arith.constant dense<0.000000e+00> : vector<16xf32>
    %15 = vector.multi_reduction <add>, %1, %cst_19 [1] : vector<16x32xf32> to vector<16xf32>
    %16 = vector.shape_cast %15 : vector<16xf32> to vector<16x1xf32>
    %cst_20 = arith.constant 3.200000e+01 : f32
    %17 = vector.broadcast %cst_20 : f32 to vector<16x1xf32>
    %18 = arith.divf %16, %17 : vector<16x1xf32>
    %19 = vector.broadcast %18 : vector<16x1xf32> to vector<16x32xf32>
    %20 = arith.subf %1, %19 : vector<16x32xf32>
    %21 = arith.mulf %20, %20 : vector<16x32xf32>
    %cst_21 = arith.constant dense<0.000000e+00> : vector<16xf32>
    %22 = vector.multi_reduction <add>, %21, %cst_21 [1] : vector<16x32xf32> to vector<16xf32>
    %23 = vector.shape_cast %22 : vector<16xf32> to vector<16x1xf32>
    %cst_22 = arith.constant 3.200000e+01 : f32
    %24 = vector.broadcast %cst_22 : f32 to vector<16x1xf32>
    %25 = arith.divf %23, %24 : vector<16x1xf32>
    %26 = vector.broadcast %18 : vector<16x1xf32> to vector<16x32xf32>
    %27 = arith.subf %1, %26 : vector<16x32xf32>
    %cst_23 = arith.constant 9.99999997E-7 : f32
    %28 = vector.broadcast %cst_23 : f32 to vector<16x1xf32>
    %29 = arith.addf %25, %28 : vector<16x1xf32>
    %30 = math.rsqrt %29 : vector<16x1xf32>
    %31 = vector.broadcast %30 : vector<16x1xf32> to vector<16x32xf32>
    %32 = arith.mulf %27, %31 : vector<16x32xf32>
    %33 = vector.broadcast %13 : vector<1x32xf32> to vector<16x32xf32>
    %34 = arith.mulf %32, %33 : vector<16x32xf32>
    %35 = vector.broadcast %14 : vector<1x32xf32> to vector<16x32xf32>
    %36 = arith.addf %34, %35 : vector<16x32xf32>
    %37 = arith.truncf %36 : vector<16x32xf32> to vector<16x32xbf16>
    %c0_24 = arith.constant 0 : index
    %c0_25 = arith.constant 0 : index
    %38 = vector.load %arg7[%c0_24, %c0_25] : memref<32x96xbf16, #tpu.memory_space<vmem>>, vector<32x96xbf16>
    %cst_26 = arith.constant dense<0.000000e+00> : vector<16x96xf32>
    %39 = tpu.matmul %37, %38, %cst_26 {dimension_numbers = #tpu.dot_dimension_numbers<[1], [0], [0], [1], [0, 0, 1, 1], [], []>} : vector<16x32xbf16>, vector<32x96xbf16>, vector<16x96xf32> -> vector<16x96xf32>
    %c0_27 = arith.constant 0 : index
    %c0_28 = arith.constant 0 : index
    %40 = vector.load %arg8[%c0_27, %c0_28] : memref<1x96xf32, #tpu.memory_space<vmem>>, vector<1x96xf32>
    %41 = vector.broadcast %40 : vector<1x96xf32> to vector<16x96xf32>
    %42 = arith.addf %39, %41 : vector<16x96xf32>
    %43 = vector.extract_strided_slice %42 {offsets = [0, 0], sizes = [16, 32], strides = [1, 1]} : vector<16x96xf32> to vector<16x32xf32>
    %cst_29 = arith.constant 0.353553385 : f32
    %44 = vector.broadcast %cst_29 : f32 to vector<16x32xf32>
    %45 = arith.mulf %43, %44 : vector<16x32xf32>
    %46 = vector.shape_cast %45 : vector<16x32xf32> to vector<16x4x8xf32>
    %47 = arith.truncf %46 : vector<16x4x8xf32> to vector<16x4x8xbf16>
    %48 = vector.extract_strided_slice %42 {offsets = [0, 32], sizes = [16, 32], strides = [1, 1]} : vector<16x96xf32> to vector<16x32xf32>
    %49 = vector.shape_cast %48 : vector<16x32xf32> to vector<16x4x8xf32>
    %50 = arith.truncf %49 : vector<16x4x8xf32> to vector<16x4x8xbf16>
    %51 = vector.extract_strided_slice %42 {offsets = [0, 64], sizes = [16, 32], strides = [1, 1]} : vector<16x96xf32> to vector<16x32xf32>
    %52 = vector.shape_cast %51 : vector<16x32xf32> to vector<16x4x8xf32>
    %53 = arith.truncf %52 : vector<16x4x8xf32> to vector<16x4x8xbf16>
    "tpu.trace_start"() <{level = 10 : i32, message = "qhd,khd->hqk"}> : () -> ()
    %cst_30 = arith.constant dense<0.000000e+00> : vector<4x16x16xf32>
    %54 = tpu.matmul %47, %50, %cst_30 {dimension_numbers = #tpu.dot_dimension_numbers<[2], [2], [0], [0], [0, 1, 0, 0, 1, 0], [1], [1]>} : vector<16x4x8xbf16>, vector<16x4x8xbf16>, vector<4x16x16xf32> -> vector<4x16x16xf32>
    "tpu.trace_stop"() : () -> ()
    "tpu.trace_start"() <{level = 10 : i32, message = "qhd,qkd->hqk"}> : () -> ()
    %cst_31 = arith.constant dense<0.000000e+00> : vector<16x16x4xf32>
    %55 = tpu.matmul %3, %47, %cst_31 {dimension_numbers = #tpu.dot_dimension_numbers<[2], [2], [1], [1], [0, 0, 0, 1, 1, 1], [0], [0]>} : vector<16x16x8xbf16>, vector<16x4x8xbf16>, vector<16x16x4xf32> -> vector<16x16x4xf32>
    %56 = tpu.transpose %55, [2, 0, 1] : vector<16x16x4xf32> -> vector<4x16x16xf32>
    "tpu.trace_stop"() : () -> ()
    %57 = arith.addf %54, %56 : vector<4x16x16xf32>
    %58 = vector.shape_cast %12 : vector<16x16xf32> to vector<1x16x16xf32>
    %59 = vector.broadcast %58 : vector<1x16x16xf32> to vector<4x16x16xf32>
    %60 = arith.addf %57, %59 : vector<4x16x16xf32>
    %cst_32 = arith.constant dense<0xFF800000> : vector<4x16xf32>
    %61 = vector.multi_reduction <maximumf>, %60, %cst_32 [2] : vector<4x16x16xf32> to vector<4x16xf32>
    %62 = vector.shape_cast %61 : vector<4x16xf32> to vector<4x16x1xf32>
    %63 = vector.broadcast %62 : vector<4x16x1xf32> to vector<4x16x16xf32>
    %64 = arith.subf %60, %63 : vector<4x16x16xf32>
    %65 = math.exp %64 : vector<4x16x16xf32>
    %cst_33 = arith.constant dense<0.000000e+00> : vector<4x16xf32>
    %66 = vector.multi_reduction <add>, %65, %cst_33 [2] : vector<4x16x16xf32> to vector<4x16xf32>
    %67 = vector.shape_cast %66 : vector<4x16xf32> to vector<4x16x1xf32>
    %68 = tpu.reciprocal %67 {approx = true} : vector<4x16x1xf32> -> vector<4x16x1xf32>
    %69 = vector.broadcast %68 : vector<4x16x1xf32> to vector<4x16x16xf32>
    %70 = arith.mulf %65, %69 : vector<4x16x16xf32>
    %71 = arith.truncf %70 : vector<4x16x16xf32> to vector<4x16x16xbf16>
    "tpu.trace_start"() <{level = 10 : i32, message = "hqk,khd->qhd"}> : () -> ()
    %cst_34 = arith.constant dense<0.000000e+00> : vector<4x8x16xf32>
    %72 = tpu.matmul %53, %71, %cst_34 {dimension_numbers = #tpu.dot_dimension_numbers<[0], [2], [2], [1], [0, 1, 0, 2, 1, 1], [1], [0]>} : vector<16x4x8xbf16>, vector<4x16x16xbf16>, vector<4x8x16xf32> -> vector<4x8x16xf32>
    %73 = tpu.transpose %72, [2, 0, 1] : vector<4x8x16xf32> -> vector<16x4x8xf32>
    "tpu.trace_stop"() : () -> ()
    "tpu.trace_start"() <{level = 10 : i32, message = "hqk,qkd->qhd"}> : () -> ()
    %cst_35 = arith.constant dense<0.000000e+00> : vector<16x4x8xf32>
    %74 = tpu.matmul %71, %5, %cst_35 {dimension_numbers = #tpu.dot_dimension_numbers<[2], [1], [0], [2], [0, 1, 0, 0, 1, 2], [1], [0]>} : vector<4x16x16xbf16>, vector<16x16x8xbf16>, vector<16x4x8xf32> -> vector<16x4x8xf32>
    "tpu.trace_stop"() : () -> ()
    %75 = arith.addf %73, %74 : vector<16x4x8xf32>
    %76 = vector.shape_cast %75 : vector<16x4x8xf32> to vector<16x32xf32>
    %77 = arith.truncf %76 : vector<16x32xf32> to vector<16x32xbf16>
    %c0_36 = arith.constant 0 : index
    %c0_37 = arith.constant 0 : index
    %78 = vector.load %arg9[%c0_36, %c0_37] : memref<32x32xbf16, #tpu.memory_space<vmem>>, vector<32x32xbf16>
    %cst_38 = arith.constant dense<0.000000e+00> : vector<16x32xf32>
    %79 = tpu.matmul %77, %78, %cst_38 {dimension_numbers = #tpu.dot_dimension_numbers<[1], [0], [0], [1], [0, 0, 1, 1], [], []>} : vector<16x32xbf16>, vector<32x32xbf16>, vector<16x32xf32> -> vector<16x32xf32>
    %c0_39 = arith.constant 0 : index
    %c0_40 = arith.constant 0 : index
    %80 = vector.load %arg10[%c0_39, %c0_40] : memref<1x32xf32, #tpu.memory_space<vmem>>, vector<1x32xf32>
    %81 = vector.broadcast %80 : vector<1x32xf32> to vector<16x32xf32>
    %82 = arith.addf %79, %81 : vector<16x32xf32>
    %83 = arith.addf %1, %82 : vector<16x32xf32>
    %c0_41 = arith.constant 0 : index
    %c0_42 = arith.constant 0 : index
    %84 = vector.load %arg11[%c0_41, %c0_42] : memref<1x32xf32, #tpu.memory_space<vmem>>, vector<1x32xf32>
    %c0_43 = arith.constant 0 : index
    %c0_44 = arith.constant 0 : index
    %85 = vector.load %arg12[%c0_43, %c0_44] : memref<1x32xf32, #tpu.memory_space<vmem>>, vector<1x32xf32>
    %cst_45 = arith.constant dense<0.000000e+00> : vector<16xf32>
    %86 = vector.multi_reduction <add>, %83, %cst_45 [1] : vector<16x32xf32> to vector<16xf32>
    %87 = vector.shape_cast %86 : vector<16xf32> to vector<16x1xf32>
    %cst_46 = arith.constant 3.200000e+01 : f32
    %88 = vector.broadcast %cst_46 : f32 to vector<16x1xf32>
    %89 = arith.divf %87, %88 : vector<16x1xf32>
    %90 = vector.broadcast %89 : vector<16x1xf32> to vector<16x32xf32>
    %91 = arith.subf %83, %90 : vector<16x32xf32>
    %92 = arith.mulf %91, %91 : vector<16x32xf32>
    %cst_47 = arith.constant dense<0.000000e+00> : vector<16xf32>
    %93 = vector.multi_reduction <add>, %92, %cst_47 [1] : vector<16x32xf32> to vector<16xf32>
    %94 = vector.shape_cast %93 : vector<16xf32> to vector<16x1xf32>
    %cst_48 = arith.constant 3.200000e+01 : f32
    %95 = vector.broadcast %cst_48 : f32 to vector<16x1xf32>
    %96 = arith.divf %94, %95 : vector<16x1xf32>
    %97 = vector.broadcast %89 : vector<16x1xf32> to vector<16x32xf32>
    %98 = arith.subf %83, %97 : vector<16x32xf32>
    %cst_49 = arith.constant 9.99999997E-7 : f32
    %99 = vector.broadcast %cst_49 : f32 to vector<16x1xf32>
    %100 = arith.addf %96, %99 : vector<16x1xf32>
    %101 = math.rsqrt %100 : vector<16x1xf32>
    %102 = vector.broadcast %101 : vector<16x1xf32> to vector<16x32xf32>
    %103 = arith.mulf %98, %102 : vector<16x32xf32>
    %104 = vector.broadcast %84 : vector<1x32xf32> to vector<16x32xf32>
    %105 = arith.mulf %103, %104 : vector<16x32xf32>
    %106 = vector.broadcast %85 : vector<1x32xf32> to vector<16x32xf32>
    %107 = arith.addf %105, %106 : vector<16x32xf32>
    %108 = arith.truncf %107 : vector<16x32xf32> to vector<16x32xbf16>
    %c0_50 = arith.constant 0 : index
    %c0_51 = arith.constant 0 : index
    %109 = vector.load %arg13[%c0_50, %c0_51] : memref<32x64xbf16, #tpu.memory_space<vmem>>, vector<32x64xbf16>
    %cst_52 = arith.constant dense<0.000000e+00> : vector<16x64xf32>
    %110 = tpu.matmul %108, %109, %cst_52 {dimension_numbers = #tpu.dot_dimension_numbers<[1], [0], [0], [1], [0, 0, 1, 1], [], []>} : vector<16x32xbf16>, vector<32x64xbf16>, vector<16x64xf32> -> vector<16x64xf32>
    %c0_53 = arith.constant 0 : index
    %c0_54 = arith.constant 0 : index
    %111 = vector.load %arg14[%c0_53, %c0_54] : memref<1x64xf32, #tpu.memory_space<vmem>>, vector<1x64xf32>
    %112 = vector.broadcast %111 : vector<1x64xf32> to vector<16x64xf32>
    %113 = arith.addf %110, %112 : vector<16x64xf32>
    %cst_55 = arith.constant 0.000000e+00 : f32
    %114 = vector.broadcast %cst_55 : f32 to vector<16x64xf32>
    %115 = arith.maximumf %113, %114 : vector<16x64xf32>
    %116 = arith.truncf %115 : vector<16x64xf32> to vector<16x64xbf16>
    %c0_56 = arith.constant 0 : index
    %c0_57 = arith.constant 0 : index
    %117 = vector.load %arg15[%c0_56, %c0_57] : memref<64x32xbf16, #tpu.memory_space<vmem>>, vector<64x32xbf16>
    %cst_58 = arith.constant dense<0.000000e+00> : vector<16x32xf32>
    %118 = tpu.matmul %116, %117, %cst_58 {dimension_numbers = #tpu.dot_dimension_numbers<[1], [0], [0], [1], [0, 0, 1, 1], [], []>} : vector<16x64xbf16>, vector<64x32xbf16>, vector<16x32xf32> -> vector<16x32xf32>
    %c0_59 = arith.constant 0 : index
    %c0_60 = arith.constant 0 : index
    %119 = vector.load %arg16[%c0_59, %c0_60] : memref<1x32xf32, #tpu.memory_space<vmem>>, vector<1x32xf32>
    %120 = vector.broadcast %119 : vector<1x32xf32> to vector<16x32xf32>
    %121 = arith.addf %118, %120 : vector<16x32xf32>
    %122 = arith.addf %83, %121 : vector<16x32xf32>
    %c0_61 = arith.constant 0 : index
    %c0_62 = arith.constant 0 : index
    %c0_63 = arith.constant 0 : index
    %123 = vector.load %arg17[%c0_61, %c0_62, %c0_63] : memref<1x16x32xf32, #tpu.memory_space<vmem>>, vector<1x16x32xf32>
    %124 = vector.shape_cast %123 : vector<1x16x32xf32> to vector<16x32xf32>
    %125 = vector.shape_cast %122 : vector<16x32xf32> to vector<1x16x32xf32>
    tpu.vector_store %arg17[%c0_61, %c0_62, %c0_63], %125 {strides = array<i32>} : memref<1x16x32xf32, #tpu.memory_space<vmem>>, vector<1x16x32xf32>,
    return
  }
  func.func @transform_0(%arg0: i32) -> (i32, i32, i32) {
    %c0_i32 = arith.constant 0 : i32
    %c0_i32_0 = arith.constant 0 : i32
    %c0_i32_1 = arith.constant 0 : i32
    return %arg0, %c0_i32, %c0_i32_0 : i32, i32, i32
  }
  func.func @transform_1(%arg0: i32) -> (i32, i32, i32, i32) {
    %c0_i32 = arith.constant 0 : i32
    %c0_i32_0 = arith.constant 0 : i32
    %c0_i32_1 = arith.constant 0 : i32
    %c0_i32_2 = arith.constant 0 : i32
    return %arg0, %c0_i32, %c0_i32_0, %c0_i32_1 : i32, i32, i32, i32
  }
  func.func @transform_2(%arg0: i32) -> (i32, i32, i32, i32) {
    %c0_i32 = arith.constant 0 : i32
    %c0_i32_0 = arith.constant 0 : i32
    %c0_i32_1 = arith.constant 0 : i32
    %c0_i32_2 = arith.constant 0 : i32
    return %arg0, %c0_i32, %c0_i32_0, %c0_i32_1 : i32, i32, i32, i32
  }
  func.func @transform_3(%arg0: i32) -> (i32, i32, i32) {
    %c0_i32 = arith.constant 0 : i32
    %c0_i32_0 = arith.constant 0 : i32
    %c0_i32_1 = arith.constant 0 : i32
    return %arg0, %c0_i32, %c0_i32_0 : i32, i32, i32
  }
  func.func @transform_4(%arg0: i32) -> (i32, i32) {
    %c0_i32 = arith.constant 0 : i32
    %c0_i32_0 = arith.constant 0 : i32
    %c0_i32_1 = arith.constant 0 : i32
    return %c0_i32, %c0_i32_0 : i32, i32
  }
  func.func @transform_5(%arg0: i32) -> (i32, i32) {
    %c0_i32 = arith.constant 0 : i32
    %c0_i32_0 = arith.constant 0 : i32
    %c0_i32_1 = arith.constant 0 : i32
    return %c0_i32, %c0_i32_0 : i32, i32
  }
  func.func @transform_6(%arg0: i32) -> (i32, i32) {
    %c0_i32 = arith.constant 0 : i32
    %c0_i32_0 = arith.constant 0 : i32
    %c0_i32_1 = arith.constant 0 : i32
    return %c0_i32, %c0_i32_0 : i32, i32
  }
  func.func @transform_7(%arg0: i32) -> (i32, i32) {
    %c0_i32 = arith.constant 0 : i32
    %c0_i32_0 = arith.constant 0 : i32
    %c0_i32_1 = arith.constant 0 : i32
    return %c0_i32, %c0_i32_0 : i32, i32
  }
  func.func @transform_8(%arg0: i32) -> (i32, i32) {
    %c0_i32 = arith.constant 0 : i32
    %c0_i32_0 = arith.constant 0 : i32
    %c0_i32_1 = arith.constant 0 : i32
    return %c0_i32, %c0_i32_0 : i32, i32
  }
  func.func @transform_9(%arg0: i32) -> (i32, i32) {
    %c0_i32 = arith.constant 0 : i32
    %c0_i32_0 = arith.constant 0 : i32
    %c0_i32_1 = arith.constant 0 : i32
    return %c0_i32, %c0_i32_0 : i32, i32
  }
  func.func @transform_10(%arg0: i32) -> (i32, i32) {
    %c0_i32 = arith.constant 0 : i32
    %c0_i32_0 = arith.constant 0 : i32
    %c0_i32_1 = arith.constant 0 : i32
    return %c0_i32, %c0_i32_0 : i32, i32
  }
  func.func @transform_11(%arg0: i32) -> (i32, i32) {
    %c0_i32 = arith.constant 0 : i32
    %c0_i32_0 = arith.constant 0 : i32
    %c0_i32_1 = arith.constant 0 : i32
    return %c0_i32, %c0_i32_0 : i32, i32
  }
  func.func @transform_12(%arg0: i32) -> (i32, i32) {
    %c0_i32 = arith.constant 0 : i32
    %c0_i32_0 = arith.constant 0 : i32
    %c0_i32_1 = arith.constant 0 : i32
    return %c0_i32, %c0_i32_0 : i32, i32
  }
  func.func @transform_13(%arg0: i32) -> (i32, i32) {
    %c0_i32 = arith.constant 0 : i32
    %c0_i32_0 = arith.constant 0 : i32
    %c0_i32_1 = arith.constant 0 : i32
    return %c0_i32, %c0_i32_0 : i32, i32
  }
  func.func @transform_14(%arg0: i32) -> (i32, i32) {
    %c0_i32 = arith.constant 0 : i32
    %c0_i32_0 = arith.constant 0 : i32
    %c0_i32_1 = arith.constant 0 : i32
    return %c0_i32, %c0_i32_0 : i32, i32
  }
  func.func @transform_15(%arg0: i32) -> (i32, i32) {
    %c0_i32 = arith.constant 0 : i32
    %c0_i32_0 = arith.constant 0 : i32
    %c0_i32_1 = arith.constant 0 : i32
    return %c0_i32, %c0_i32_0 : i32, i32
  }
  func.func @transform_16(%arg0: i32) -> (i32, i32, i32) {
    %c0_i32 = arith.constant 0 : i32
    %c0_i32_0 = arith.constant 0 : i32
    %c0_i32_1 = arith.constant 0 : i32
    return %arg0, %c0_i32, %c0_i32_0 : i32, i32, i32
  }
}

</mosaic_0001>

<bundles_post_ra>
// kernel: encoder_layer_forward.1
= control target key start
LH: loop header
LB: loop body
LE: loop exit
PB: predicated region body
PF: predicated region fallthrough
CT: control target
= control target key end

     0   :  { %s8309_s0 = inlined_call_operand.vmem [shape: f32[2,16,32], index: 0, kind: input, shape index: {}]   ;;  %s8310_s1 = inlined_call_operand.vmem [shape: bf16[2,16,16,8], index: 1, kind: input, shape index: {}]   ;;  %s8311_s2 = inlined_call_operand.vmem [shape: bf16[2,16,16,8], index: 2, kind: input, shape index: {}]   ;;  %s8312_s3 = inlined_call_operand.vmem [shape: f32[2,16,16], index: 3, kind: input, shape index: {}]   ;;  %s8313_s4 = inlined_call_operand.vmem [shape: f32[1,32], index: 4, kind: input, shape index: {}]   ;;  %s8314_s5 = inlined_call_operand.vmem [shape: f32[1,32], index: 5, kind: input, shape index: {}]   ;;  %s8315_s6 = inlined_call_operand.vmem [shape: bf16[32,96], index: 6, kind: input, shape index: {}]   ;;  %s8316_s7 = inlined_call_operand.vmem [shape: f32[1,96], index: 7, kind: input, shape index: {}]   ;;  %s8317_s8 = inlined_call_operand.vmem [shape: bf16[32,32], index: 8, kind: input, shape index: {}]   ;;  %s8318_s9 = inlined_call_operand.vmem [shape: f32[1,32], index: 9, kind: input, shape index: {}]   ;;  %s8319_s10 = inlined_call_operand.vmem [shape: f32[1,32], index: 10, kind: input, shape index: {}]   ;;  %s8320_s11 = inlined_call_operand.vmem [shape: f32[1,32], index: 11, kind: input, shape index: {}]   ;;  %s8321_s12 = inlined_call_operand.vmem [shape: bf16[32,64], index: 12, kind: input, shape index: {}]   ;;  %s8322_s13 = inlined_call_operand.vmem [shape: f32[1,64], index: 13, kind: input, shape index: {}]   ;;  %s8323_s14 = inlined_call_operand.vmem [shape: bf16[64,32], index: 14, kind: input, shape index: {}]   ;;  %s8324_s15 = inlined_call_operand.vmem [shape: f32[1,32], index: 15, kind: input, shape index: {}]   ;;  %s8325_s16 = inlined_call_operand.hbm [shape: f32[2,16,32], index: 16, kind: output, shape index: {}]  }
   0x1   :  { %8332 = sst [smem:[#allocation11_spill]] %s8309_s0 }
   0x2   :  { %21 = vsyncpa [#allocation3], 0 }
   0x3   :  { %23 = vsyncpa [#allocation3 + $0x1], 0  ;;  %s7179_s21 = smov 0   ;;  %s7181_s22 = smov 0  }
   0x4   :  { %s7183_s23 = smov 0   ;;  %s7185_s24 = smov 0  }
   0x5 LB: > { %8333 = sst [smem:[#allocation5_spill]] %s7064_s21  ;;  %s7200_s25 = sadd.s32 4294967295, %s7076_s24   ;;  %s7076_s24 = sphi %s7185_s24, %s8345_s24   ;;  %s7072_s23 = sphi %s7183_s23, %s8347_s23   ;;  %s7068_s22 = sphi %s7181_s22, %s8349_s22   ;;  %s7064_s21 = sphi %s7179_s21, %s8348_s21  }
   0x6   : > { %8334 = sst [smem:[#allocation6_spill]] %s7072_s23  ;;  %s6368_s26 = sadd.s32 4294967294, %s7076_s24  }
   0x7   : > { %8335 = sst [smem:[#allocation7_spill]] %s7076_s24  ;;  %s7204_s27 = sadd.s32 1, %s7076_s24  }
   0x8   : > { %8336 = sst [smem:[#allocation8_spill]] %s7204_s27  ;;  %s392_s28 = sadd.s32 1, %s7072_s23 }
   0x9   : > { %s389_s29 = ssub.s32 %s7076_s24, %s7204_s27  ;;  %p402_p0 = scmp.ne.s32.totalorder %s7072_s23, %s7068_s22 }
   0xa   : > { %p390_p1 = scmp.eq.s32.totalorder %s389_s29, 0  ;;  %p403_p2 = scmp.eq.s32.totalorder %s7200_s25, 1 }
   0xb   : > { %p408_p3 = scmp.ne.s32.totalorder %s7068_s22, %s7064_s21  ;;  %p409_p4 = scmp.eq.s32.totalorder %s6368_s26, 1 }
   0xc   : > { %s7215_s30 = scalar_select %p390_p1, %s7072_s23, %s392_s28  }
   0xd   : > { %p7217_p5 = por %p403_p2, %p402_p0  ;;  %p7221_p6 = por %p409_p4, %p408_p3 }
   0xe   : > { %8337 = sst [smem:[#allocation9_spill]] %s7215_s30  ;;  %p6371_p7 = scmp.ge.s32.totalorder %s7076_s24, 1 }
   0xf   : > { %s8339_s17 = scalar_select %p7221_p6, 1, 0 }
  0x10   : > { %p495_p8 = scmp.lt.s32.totalorder %s7076_s24, 3 }
  0x11   : > { %8340 = sst [smem:[#allocation10_spill]] %s8339_s17 }
  0x12   : > { %p496_p9 = pnand %p6371_p7, %p495_p8 }
  0x13   : > { %p560_p10 = scmp.lt.s32.totalorder (!%p496_p9), %s7200_s25, 1  ;;  %s8341_s29 = sld [smem:[#allocation11_spill]] (!%p496_p9) }
  0x14   : > { %499 = sbr.rel (%p496_p9) target bundleno = 3089 (0xc11), region = 84  ;;  %s7080_s24 = smov (!%p496_p9), 112  }
  0x15   : > { %s7082_s28 = smov (!%p496_p9), 104  }
  0x19   : > { %s7229_s18 = scalar_select %p560_p10, %s7200_s25, 1  ;;  %vm655_vm0 = vcmask 261120   ;;  %v6932_v14 = vld [vmem:[%s8315_s6 + $0x8] sm:$0xff]   ;;  %v7078_v15 = vmov 0.0   ;;  %vm7079_vm1 = vmmov 0   ;;  %v6933_v16 = vld [vmem:[%s8315_s6] sm:$0xff]   ;;  %v794_v48 = vlaneseq }
  0x1a   : > { %6587 = vmatprep.subr.bf16.mxu0 %v7078_v15  ;;  %6591 = vmatprep.mubr.msk.bf16.mxu0 %vm7079_vm1, %v7078_v15  ;;  %v6381_v25 = vld [vmem:[%s8313_s4] ss:$0 sm:$0xff]  ;;  %v7084_v46 = vmov 1983009808   ;;  %v7085_v51 = vmov 1934713408  }
  0x1b   : > { %s6488_s19 = sshll.u32 %s7229_s18, 4  ;;  %s6489_s20 = sshll.u32 %s7229_s18, 7  ;;  %6588 = vmatpush3.bf16.msra.mxu0 %v6932_v14  ;;  %6595 = vmatprep.subr.bf16.mxu1 %v7078_v15  ;;  %v6382_v29 = vld [vmem:[%s8314_s5] ss:$0 sm:$0xff]  ;;  %v792_v47 = vunpack.c.l.s4 %v7084_v46  ;;  %v824_v52 = vunpack.c.l.s4 %v7085_v51  ;;  %v795_v54 = vshrl.u32 %v794_v48, 7  ;;  %vm1312_vm2 = vcmask 64512  }
  0x1c   : > { %s7238_s30 = scalar_lea.vmem %s8341_s29, %s6488_s19  ;;  %s7243_s17 = scalar_lea.vmem %s8310_s1, %s6489_s20  ;;  %6589 = vmatprep.subr.bf16.mxu0 %v7078_v15  ;;  %6597 = vmatprep.mubr.msk.bf16.mxu1 %vm7079_vm1, %v7078_v15  ;;  %v6383_v34 = vld [vmem:[%s8316_s7] ss:$0 sm:$0xff]  ;;  %vm3517_vm3 = vcmask 1043456   ;;  %vm3711_vm5 = vcmask 130048   ;;  %vm5980_vm7 = vcmask 195584   ;;  %vm6207_vm8 = vcmask 523264  }
  0x1d   : > { %v581_v0 = vld [vmem:[%s7238_s30] sm:$0xff]  ;;  %v582_v1 = vld [vmem:[%s7238_s30 + $0x8] sm:$0xff]  ;;  %s7252_s26 = scalar_lea.vmem %s8311_s2, %s6489_s20  ;;  %s7081_s20 = smov 120   ;;  %v793_v53 = vunpack.c.0.s8 %v792_v47  ;;  %v825_v58 = vunpack.c.0.s8 %v824_v52  ;;  %v6937_v47 = vld [vmem:[%s7243_s17 + $0x18] sm:$0xff]  }
  0x1e   : > { %v656_v2 = vsel %vm655_vm0, %v581_v0, 0.0  ;;  %v659_v3 = vsel %vm655_vm0, %v582_v1, 0.0  ;;  %s7083_s29 = smov 96   ;;  %v6938_v52 = vld [vmem:[%s7243_s17 + $0x20] sm:$0xff]   ;;  %s7798_s21 = scalar_lea.vmem %s8312_s3, %s6488_s19 }
  0x1f   : > { %657 = vadd.xlane.f32.xlu0 %v656_v2  ;;  %6590 = vmatpush3.bf16.msra.mxu0 %v6933_v16  ;;  %v7327_v59 = vsub.s32 %v793_v53, %v795_v54 }
  0x20   : > { %6601 = vmatprep.subr.bf16.mxu0 %v7078_v15 }
  0x23   : > { %660 = vadd.xlane.f32.xlu0 %v659_v3 }
  0xa8   : > { %v658_v4 = vpop.xlane.xlu0 %657 }
  0xa9   : > { %v663_v5 = vmul.f32 0.03125, %v658_v4 }
  0xab   : > { %v665_v6 = vsub.f32 %v581_v0, %v663_v5 }
  0xac   : > { %v661_v7 = vpop.xlane.xlu0 %660 }
  0xad   : > { %v664_v8 = vmul.f32 0.03125, %v661_v7  ;;  %v667_v9 = vmul.f32 %v665_v6, %v665_v6 }
  0xaf   : > { %v666_v10 = vsub.f32 %v582_v1, %v664_v8  ;;  %v669_v11 = vsel %vm655_vm0, %v667_v9, 0.0  ;;  %v7333_v1 = vsub.s32 %v825_v58, %v795_v54  ;;  %v6939_v54 = vld [vmem:[%s7243_s17 + $0x28] sm:$0xff]  }
  0xb0   : > { %670 = vadd.xlane.f32.xlu1 %v669_v11 }
  0xb1   : > { %v668_v12 = vmul.f32 %v666_v10, %v666_v10 }
  0xb3   : > { %v672_v13 = vsel %vm655_vm0, %v668_v12, 0.0 }
  0xb4   : > { %673 = vadd.xlane.f32.xlu1 %v672_v13 }
 0x139   : > { %v671_v17 = vpop.xlane.xlu1 %670 }
 0x13a   : > { %v675_v18 = vmul.f32 0.03125, %v671_v17 }
 0x13c   : > { %v677_v19 = vadd.f32 1e-06, %v675_v18 }
 0x13d   : > { %v674_v20 = vpop.xlane.xlu1 %673 }
 0x13e   : > { %6974 = vrsqrt.f32 %v677_v19  ;;  %v676_v21 = vmul.f32 0.03125, %v674_v20 }
 0x140   : > { %v678_v22 = vadd.f32 1e-06, %v676_v21 }
 0x142   : > { %6976 = vrsqrt.f32 %v678_v22 }
 0x14b   : > { %v6975_v23 = vpop.eup %6974 }
 0x14c   : > { %v681_v24 = vmul.f32 %v6975_v23, %v665_v6 }
 0x14e   : > { %v689_v28 = vmul.f32 %v6381_v25, %v681_v24 }
 0x14f   : > { %v6977_v26 = vpop.eup %6976 }
 0x150   : > { %v682_v27 = vmul.f32 %v6977_v26, %v666_v10  ;;  %v697_v31 = vadd.f32 %v6382_v29, %v689_v28 }
 0x152   : > { %v690_v30 = vmul.f32 %v6381_v25, %v682_v27 }
 0x154   : > { %v698_v32 = vadd.f32 %v6382_v29, %v690_v30  ;;  %v6934_v29 = vld [vmem:[%s7243_s17] sm:$0xff]  }
 0x156   : > { %v699_v33 = vpack.c.bf16 %v698_v32, %v697_v31 }
 0x158   : > { %6592 = vmatmul.mubr.msk.bf16.vlgmr.msra.gmra.mxu0 %vm655_vm0, %v699_v33  ;;  %v6935_v33 = vld [vmem:[%s7243_s17 + $0x8] sm:$0xff]  }
 0x159   : > { %6603 = vmatprep.mubr.msk.bf16.mxu0 %vm7079_vm1, %v7078_v15 }
 0x218   : > { %v760_v35 = vpop.f32.mrf.mxu0 }
 0x219   : > { %v7282_v36 = vadd.f32 %v6383_v34, %v760_v35 }
 0x21a   : > { %v6593_v37 = vpop.f32.mrf.mxu0 }
 0x21b   : > { %947 = vrot.lane.b32.xlu1 %v7282_v36, %s7080_s24  ;;  %943 = vrot.lane.b32.xlu0 %v7282_v36, %s7081_s20  ;;  %v767_v41 = vmul.f32 0.35355338, %v7282_v36 }
 0x21c   : > { %v763_v38 = vpop.f32.mrf.mxu0 }
 0x21d   : > { %v7288_v39 = vadd.f32 %v6383_v34, %v763_v38 }
 0x21e   : > { %v6594_v40 = vpop.f32.mrf.mxu0 }
 0x21f   : > { %951 = vrot.lane.b32.xlu0 %v7282_v36, %s7082_s28  ;;  %945 = vrot.lane.b32.xlu1 %v7288_v39, %s7081_s20  ;;  %v7320_v55 = vmul.f32 0.35355338, %v7288_v39 }
 0x223   : > { %771 = vrot.lane.b32.xlu0 %v767_v41, %s7081_s20  ;;  %949 = vrot.lane.b32.xlu1 %v7288_v39, %s7080_s24 }
 0x227   : > { %783 = vrot.lane.b32.xlu0 %v767_v41, %s7082_s28  ;;  %953 = vrot.lane.b32.xlu1 %v7288_v39, %s7082_s28 }
 0x22b   : > { %957 = vrot.lane.b32.xlu0 %v7288_v39, %s7083_s29  ;;  %777 = vrot.lane.b32.xlu1 %v767_v41, %s7080_s24 }
 0x22f   : > { %955 = vrot.lane.b32.xlu1 %v7282_v36, %s7083_s29 }
 0x28d   : > { %v7304_v42 = vpop.permute.xlu1 %947  ;;  %v7306_v43 = vpop.permute.xlu0 %943 }
 0x28e   : > { %959 = vrot.lane.b32.xlu1 %v7306_v43, %s7083_s29 }
 0x291   : > { %v7309_v44 = vpop.permute.xlu0 %951  ;;  %v7311_v45 = vpop.permute.xlu1 %945 }
 0x292   : > { %963 = vrot.lane.b32.xlu1 %v7304_v42, %s7083_s29  ;;  %961 = vrot.lane.b32.xlu0 %v7311_v45, %s7083_s29 }
 0x295   : > { %v772_v49 = vpop.permute.xlu0 %771  ;;  %v7315_v50 = vpop.permute.xlu1 %949 }
 0x296   : > { %967 = vrot.lane.b32.xlu1 %v7309_v44, %s7083_s29  ;;  %965 = vrot.lane.b32.xlu0 %v7315_v50, %s7083_s29 }
 0x299   : > { %v784_v56 = vpop.permute.xlu0 %783  ;;  %v7322_v57 = vpop.permute.xlu1 %953 }
 0x29a   : > { %969 = vrot.lane.b32.xlu0 %v7322_v57, %s7083_s29  ;;  %773 = vrot.lane.b32.xlu1 %v7320_v55, %s7081_s20  ;;  %v805_v60 = vcombine.low %v772_v49, %v784_v56  ;;  %v806_v61 = vcombine.high %v772_v49, %v784_v56  ;;  %s7089_s20 = smov 16   ;;  %s7091_s29 = smov 24  }
 0x29c   : > { %v813_v2 = vrot.slane %v805_v60, %v7327_v59  ;;  %v820_v3 = vrot.slane %v806_v61, %v7327_v59  ;;  %v6940_v61 = vld [vmem:[%s7243_s17 + $0x30] sm:$0xff]  }
 0x29d   : > { %v778_v62 = vpop.permute.xlu1 %777 }
 0x29e   : > { %v789_v63 = vcombine.low %v767_v41, %v778_v62  ;;  %v790_v0 = vcombine.high %v767_v41, %v778_v62  ;;  %779 = vrot.lane.b32.xlu0 %v7320_v55, %s7080_s24  ;;  %785 = vrot.lane.b32.xlu1 %v7320_v55, %s7082_s28  ;;  %v6936_v41 = vld [vmem:[%s7243_s17 + $0x10] sm:$0xff]   ;;  %v6941_v62 = vld [vmem:[%s7243_s17 + $0x38] sm:$0xff]   ;;  %s7090_s28 = smov 8  }
 0x2a0   : > { %v797_v4 = vrot.slane %v789_v63, %v7327_v59  ;;  %v804_v5 = vrot.slane %v790_v0, %v7327_v59  ;;  %v7411_v0 = vpop.permute.xlu0 %957 }
 0x2a1   : > { %v956_v63 = vpop.permute.xlu1 %955 }
 0x2a2   : > { %v821_v6 = vcombine.low %v797_v4, %v813_v2  ;;  %v822_v7 = vcombine.high %v797_v4, %v813_v2  ;;  %v837_v8 = vcombine.low %v804_v5, %v820_v3  ;;  %v838_v9 = vcombine.high %v804_v5, %v820_v3 }
 0x2a4   : > { %v836_v10 = vrot.slane %v822_v7, %v7333_v1  ;;  %v845_v11 = vrot.slane %v837_v8, %v7333_v1  ;;  %v852_v12 = vrot.slane %v838_v9, %v7333_v1  ;;  %v829_v13 = vrot.slane %v821_v6, %v7333_v1 }
 0x2a6   : > { %v6420_v14 = vpack.c.bf16 %v852_v12, %v836_v10  ;;  %v925_v16 = vpack.c.bf16 %v829_v13, %v829_v13  ;;  %v6419_v17 = vpack.c.bf16 %v845_v11, %v829_v13  ;;  %v853_v18 = vcombine.high %v829_v13, %v7078_v15 }
 0x2a7   : > { %v855_v19 = vcombine.high %v845_v11, %v7078_v15  ;;  %v854_v24 = vcombine.high %v836_v10, %v7078_v15  ;;  %v856_v28 = vcombine.high %v852_v12, %v7078_v15  ;;  %v927_v30 = vpack.c.bf16 %v836_v10, %v836_v10 }
 0x2a8   : > { %v7346_v20 = vrot.slane %v6420_v14, %v7327_v59  ;;  %v1317_v21 = vsel %vm1312_vm2, %v925_v16, 0  ;;  %v7350_v22 = vrot.slane %v6419_v17, %v7327_v59  ;;  %v926_v23 = vpack.c.bf16 %v853_v18, %v853_v18 }
 0x2a9   : > { %6596 = vmatpush3.bf16.xpose.msra.mxu1 %v1317_v21  ;;  %v6423_v27 = vpack.c.bf16 %v855_v19, %v853_v18  ;;  %v6424_v32 = vpack.c.bf16 %v856_v28, %v854_v24  ;;  %v928_v34 = vpack.c.bf16 %v854_v24, %v854_v24  ;;  %v1421_v37 = vsel %vm1312_vm2, %v927_v30, 0 }
 0x2aa   : > { %v2820_v25 = vcombine.low %v7350_v22, %v7346_v20  ;;  %v1369_v26 = vsel %vm1312_vm2, %v926_v23, 0  ;;  %6607 = vmatprep.subr.bf16.mxu1 %v7078_v15  ;;  %v929_v46 = vpack.c.bf16 %v845_v11, %v845_v11  ;;  %v930_v48 = vpack.c.bf16 %v855_v19, %v855_v19 }
 0x2ab   : > { %6602 = vmatpush3.bf16.xpose.msra.mxu0 %v1369_v26  ;;  %v7361_v31 = vrot.slane %v6423_v27, %v7327_v59  ;;  %v7365_v35 = vrot.slane %v6424_v32, %v7327_v59  ;;  %v1473_v40 = vsel %vm1312_vm2, %v928_v34, 0  ;;  %v931_v53 = vpack.c.bf16 %v852_v12, %v852_v12 }
 0x2ac   : > { %6613 = vmatprep.subr.bf16.mxu0 %v7078_v15  ;;  %v1525_v49 = vsel %vm1312_vm2, %v929_v46, 0  ;;  %v1577_v51 = vsel %vm1312_vm2, %v930_v48, 0  ;;  %v932_v56 = vpack.c.bf16 %v856_v28, %v856_v28 }
 0x2ad   : > { %v2870_v38 = vcombine.low %v7361_v31, %v7365_v35  ;;  %v1629_v58 = vsel %vm1312_vm2, %v931_v53, 0 }
 0x2ae   : > { %v1681_v60 = vsel %vm1312_vm2, %v932_v56, 0 }
 0x2b0   : > { %6598 = vmatmul.mubr.msk.bf16.vlgmr.msra.gmra.mxu1 %vm1312_vm2, %v6934_v29 }
 0x2b1   : > { %6608 = vmatpush3.bf16.xpose.msra.mxu1 %v1421_v37  ;;  %6609 = vmatprep.mubr.msk.bf16.mxu1 %vm7079_vm1, %v7078_v15 }
 0x2b2   : > { %6604 = vmatmul.mubr.msk.bf16.vlgmr.msra.gmra.mxu0 %vm1312_vm2, %v6935_v33  ;;  %6619 = vmatprep.subr.bf16.mxu1 %v7078_v15 }
 0x2b3   : > { %6614 = vmatpush3.bf16.xpose.msra.mxu0 %v1473_v40  ;;  %6615 = vmatprep.mubr.msk.bf16.mxu0 %vm7079_vm1, %v7078_v15 }
 0x2b4   : > { %6625 = vmatprep.subr.bf16.mxu0 %v7078_v15 }
 0x2b8   : > { %6610 = vmatmul.mubr.msk.bf16.vlgmr.msra.gmra.mxu1 %vm1312_vm2, %v6936_v41 }
 0x2b9   : > { %6620 = vmatpush3.bf16.xpose.msra.mxu1 %v1525_v49  ;;  %6621 = vmatprep.mubr.msk.bf16.mxu1 %vm7079_vm1, %v7078_v15 }
 0x2ba   : > { %6616 = vmatmul.mubr.msk.bf16.vlgmr.msra.gmra.mxu0 %vm1312_vm2, %v6937_v47  ;;  %6631 = vmatprep.subr.bf16.mxu1 %v7078_v15 }
 0x2bb   : > { %6626 = vmatpush3.bf16.xpose.msra.mxu0 %v1577_v51  ;;  %6627 = vmatprep.mubr.msk.bf16.mxu0 %vm7079_vm1, %v7078_v15 }
 0x2bc   : > { %6637 = vmatprep.subr.bf16.mxu0 %v7078_v15 }
 0x2c0   : > { %6622 = vmatmul.mubr.msk.bf16.vlgmr.msra.gmra.mxu1 %vm1312_vm2, %v6938_v52 }
 0x2c1   : > { %6632 = vmatpush3.bf16.xpose.msra.mxu1 %v1629_v58  ;;  %6633 = vmatprep.mubr.msk.bf16.mxu1 %vm7079_vm1, %v7078_v15 }
 0x2c2   : > { %6628 = vmatmul.mubr.msk.bf16.vlgmr.msra.gmra.mxu0 %vm1312_vm2, %v6939_v54  ;;  %6643 = vmatprep.subr.bf16.mxu1 %v7078_v15 }
 0x2c3   : > { %6638 = vmatpush3.bf16.xpose.msra.mxu0 %v1681_v60  ;;  %6639 = vmatprep.mubr.msk.bf16.mxu0 %vm7079_vm1, %v7078_v15 }
 0x2c4   : > { %6649 = vmatprep.subr.bf16.mxu0 %v7078_v15 }
 0x2c8   : > { %6634 = vmatmul.mubr.msk.bf16.vlgmr.msra.gmra.mxu1 %vm1312_vm2, %v6940_v61 }
 0x2c9   : > { %6645 = vmatprep.mubr.msk.bf16.mxu1 %vm7079_vm1, %v7078_v15 }
 0x2ca   : > { %6640 = vmatmul.mubr.msk.bf16.vlgmr.msra.gmra.mxu0 %vm1312_vm2, %v6941_v62 }
 0x2cb   : > { %6651 = vmatprep.mubr.msk.bf16.mxu0 %vm7079_vm1, %v7078_v15 }
 0x300   : > { %v960_v2 = vpop.permute.xlu1 %959 }
 0x304   : > { %v962_v3 = vpop.permute.xlu0 %961  ;;  %v964_v4 = vpop.permute.xlu1 %963 }
 0x305   : > { %v979_v5 = vcombine.low %v956_v63, %v964_v4  ;;  %v980_v6 = vcombine.high %v956_v63, %v964_v4 }
 0x307   : > { %v987_v11 = vrot.slane %v979_v5, %v7327_v59  ;;  %v994_v14 = vrot.slane %v980_v6, %v7327_v59 }
 0x308   : > { %v966_v7 = vpop.permute.xlu0 %965  ;;  %v968_v8 = vpop.permute.xlu1 %967 }
 0x309   : > { %v995_v9 = vcombine.low %v960_v2, %v968_v8  ;;  %v996_v10 = vcombine.high %v960_v2, %v968_v8  ;;  %v1047_v18 = vcombine.low %v7411_v0, %v966_v7  ;;  %v1048_v4 = vcombine.high %v7411_v0, %v966_v7 }
 0x30b   : > { %v1003_v12 = vrot.slane %v995_v9, %v7327_v59  ;;  %v1010_v13 = vrot.slane %v996_v10, %v7327_v59  ;;  %v1055_v30 = vrot.slane %v1047_v18, %v7327_v59  ;;  %v1062_v18 = vrot.slane %v1048_v4, %v7327_v59 }
 0x30c   : > { %v970_v16 = vpop.permute.xlu0 %969  ;;  %v774_v17 = vpop.permute.xlu1 %773 }
 0x30d   : > { %v1063_v19 = vcombine.low %v962_v3, %v970_v16  ;;  %v1011_v21 = vcombine.low %v987_v11, %v1003_v12  ;;  %v1027_v23 = vcombine.low %v994_v14, %v1010_v13  ;;  %v1012_v27 = vcombine.high %v987_v11, %v1003_v12 }
 0x30e   : > { %v1028_v33 = vcombine.high %v994_v14, %v1010_v13  ;;  %v1064_v56 = vcombine.high %v962_v3, %v970_v16 }
 0x30f   : > { %v1071_v24 = vrot.slane %v1063_v19, %v7327_v59  ;;  %v1019_v26 = vrot.slane %v1011_v21, %v7333_v1  ;;  %v1035_v32 = vrot.slane %v1027_v23, %v7333_v1  ;;  %v1026_v49 = vrot.slane %v1012_v27, %v7333_v1 }
 0x310   : > { %v780_v28 = vpop.permute.xlu0 %779  ;;  %v786_v29 = vpop.permute.xlu1 %785  ;;  %v1042_v60 = vrot.slane %v1028_v33, %v7333_v1  ;;  %v1078_v11 = vrot.slane %v1064_v56, %v7327_v59 }
 0x311   : > { %v857_v34 = vcombine.low %v7320_v55, %v780_v28  ;;  %v858_v37 = vcombine.high %v7320_v55, %v780_v28  ;;  %v873_v40 = vcombine.low %v774_v17, %v786_v29  ;;  %v874_v41 = vcombine.high %v774_v17, %v786_v29 }
 0x312   : > { %v1079_v46 = vcombine.low %v1055_v30, %v1071_v24  ;;  %v1115_v47 = vpack.c.bf16 %v1019_v26, %v1019_v26  ;;  %v1043_v48 = vcombine.high %v1019_v26, %v7078_v15  ;;  %v1045_v55 = vcombine.high %v1035_v32, %v7078_v15 }
 0x313   : > { %v865_v51 = vrot.slane %v857_v34, %v7327_v59  ;;  %v872_v52 = vrot.slane %v858_v37, %v7327_v59  ;;  %v881_v53 = vrot.slane %v873_v40, %v7327_v59  ;;  %v888_v54 = vrot.slane %v874_v41, %v7327_v59 }
 0x314   : > { %2900 = vxpose.xlu0.c.b16.start.end [1/1] (short) (narrow) %v1115_v47, 16  ;;  %v1116_v58 = vpack.c.bf16 %v1043_v48, %v1043_v48  ;;  %v1117_v5 = vpack.c.bf16 %v1026_v49, %v1026_v49  ;;  %v7434_v6 = vrot.slane %v1079_v46, %v7333_v1  ;;  %v1080_v12 = vcombine.high %v1055_v30, %v1071_v24  ;;  %v6942_v47 = vld [vmem:[%s7243_s17 + $0x40] sm:$0xff]  }
 0x315   : > { %v889_v61 = vcombine.low %v865_v51, %v881_v53  ;;  %v890_v62 = vcombine.high %v865_v51, %v881_v53  ;;  %v905_v63 = vcombine.low %v872_v52, %v888_v54  ;;  %v906_v2 = vcombine.high %v872_v52, %v888_v54  ;;  %v6943_v54 = vld [vmem:[%s7243_s17 + $0x48] sm:$0xff]  }
 0x316   : > { %2916 = vxpose.xlu1.c.b16.start.end [1/1] (short) (narrow) %v1116_v58, 16  ;;  %v1120_v0 = vpack.c.bf16 %v1045_v55, %v1045_v55  ;;  %v1046_v7 = vcombine.high %v1042_v60, %v7078_v15  ;;  %v1119_v19 = vpack.c.bf16 %v1035_v32, %v1035_v32  ;;  %v1111_v24 = vcombine.high %v7434_v6, %v7078_v15 }
 0x317   : > { %v897_v8 = vrot.slane %v889_v61, %v7333_v1  ;;  %v904_v3 = vrot.slane %v890_v62, %v7333_v1  ;;  %v7439_v9 = vrot.slane %v905_v63, %v7333_v1  ;;  %v7442_v10 = vrot.slane %v906_v2, %v7333_v1 }
 0x318   : > { %2932 = vxpose.xlu0.c.b16.start.end [1/1] (short) (narrow) %v1117_v5, 16  ;;  %v1095_v26 = vcombine.low %v1062_v18, %v1078_v11  ;;  %v1122_v27 = vpack.c.bf16 %v1046_v7, %v1046_v7  ;;  %v7454_v28 = vrot.slane %v1080_v12, %v7333_v1  ;;  %v1121_v34 = vpack.c.bf16 %v1042_v60, %v1042_v60 }
 0x319   : > { %v6421_v13 = vpack.c.bf16 %v7439_v9, %v897_v8  ;;  %v6422_v14 = vpack.c.bf16 %v7442_v10, %v904_v3  ;;  %v933_v16 = vpack.c.bf16 %v897_v8, %v897_v8  ;;  %v921_v17 = vcombine.high %v897_v8, %v7078_v15 }
 0x31a   : > { %2980 = vxpose.xlu1.c.b16.start.end [1/1] (short) (narrow) %v1120_v0, 16  ;;  %v922_v33 = vcombine.high %v904_v3, %v7078_v15  ;;  %v1044_v37 = vcombine.high %v1026_v49, %v7078_v15  ;;  %v7464_v40 = vcombine.high %v7439_v9, %v7078_v15  ;;  %v1096_v41 = vcombine.high %v1062_v18, %v1078_v11  ;;  %v6944_v0 = vld [vmem:[%s7243_s17 + $0x50] sm:$0xff]  }
 0x31b   : > { %v1733_v21 = vsel %vm1312_vm2, %v933_v16, 0  ;;  %v934_v23 = vpack.c.bf16 %v921_v17, %v921_v17  ;;  %v2811_v29 = vrot.slane %v6421_v13, %v7327_v59  ;;  %v2819_v30 = vrot.slane %v6422_v14, %v7327_v59 }
 0x31c   : > { %2964 = vxpose.xlu0.c.b16.start.end [1/1] (short) (narrow) %v1119_v19, 16  ;;  %6644 = vmatpush3.bf16.xpose.msra.mxu1 %v1733_v21  ;;  %v1124_v46 = vpack.c.bf16 %v1111_v24, %v1111_v24  ;;  %v935_v48 = vpack.c.bf16 %v904_v3, %v904_v3  ;;  %v1112_v51 = vcombine.high %v7454_v28, %v7078_v15 }
 0x31d   : > { %v1785_v32 = vsel %vm1312_vm2, %v934_v23, 0  ;;  %6655 = vmatprep.subr.bf16.mxu1 %v7078_v15  ;;  %v7471_v52 = vrot.slane %v1095_v26, %v7333_v1  ;;  %v6425_v53 = vpack.c.bf16 %v7464_v40, %v921_v17  ;;  %v7476_v49 = vcombine.high %v7442_v10, %v7078_v15  ;;  %v6945_v17 = vld [vmem:[%s7243_s17 + $0x58] sm:$0xff]  }
 0x31e   : > { %3012 = vxpose.xlu1.c.b16.start.end [1/1] (short) (narrow) %v1122_v27, 16  ;;  %6650 = vmatpush3.bf16.xpose.msra.mxu0 %v1785_v32  ;;  %v936_v56 = vpack.c.bf16 %v922_v33, %v922_v33  ;;  %v2828_v58 = vcombine.low %v2811_v29, %v2819_v30  ;;  %v1118_v55 = vpack.c.bf16 %v1044_v37, %v1044_v37  ;;  %v1837_v62 = vsel %vm1312_vm2, %v935_v48, 0  ;;  %v6948_v48 = vld [vmem:[%s7243_s17 + $0x70] sm:$0xff]  }
 0x31f   : > { %6661 = vmatprep.subr.bf16.mxu0 %v7078_v15  ;;  %v2861_v60 = vrot.slane %v6425_v53, %v7327_v59  ;;  %v6426_v61 = vpack.c.bf16 %v7476_v49, %v922_v33  ;;  %v7484_v63 = vrot.slane %v1096_v41, %v7333_v1  ;;  %v2827_v2 = vrot.slane %v2820_v25, %v7333_v1 }
 0x320   : > { %2996 = vxpose.xlu0.c.b16.start.end [1/1] (short) (narrow) %v1121_v34, 16  ;;  %v2835_v4 = vrot.slane %v2828_v58, %v7333_v1  ;;  %v1126_v5 = vpack.c.bf16 %v1112_v51, %v1112_v51  ;;  %v1113_v8 = vcombine.high %v7471_v52, %v7078_v15  ;;  %v1889_v11 = vsel %vm1312_vm2, %v936_v56, 0  ;;  %v6946_v34 = vld [vmem:[%s7243_s17 + $0x60] sm:$0xff]   ;;  %v6949_v51 = vld [vmem:[%s7243_s17 + $0x78] sm:$0xff]  }
 0x321   : > { %v2869_v3 = vrot.slane %v6426_v61, %v7327_v59  ;;  %v1123_v25 = vpack.c.bf16 %v7434_v6, %v7434_v6  ;;  %v937_v7 = vpack.c.bf16 %v7439_v9, %v7439_v9  ;;  %v1114_v13 = vcombine.high %v7484_v63, %v7078_v15 }
 0x322   : > { %3044 = vxpose.xlu1.c.b16.start.end [1/1] (short) (narrow) %v1124_v46, 16  ;;  %v7498_v20 = vcombine.low %v2827_v2, %v2835_v4  ;;  %v7500_v22 = vcombine.high %v2827_v2, %v2835_v4  ;;  %v2877_v14 = vrot.slane %v2870_v38, %v7333_v1  ;;  %v1128_v6 = vpack.c.bf16 %v1113_v8, %v1113_v8 }
 0x323   : > { %6646 = vmatmul.mubr.msk.bf16.vlgmr.msra.gmra.mxu1 %vm1312_vm2, %v6942_v47  ;;  %v2878_v12 = vcombine.low %v2861_v60, %v2869_v3  ;;  %v938_v9 = vpack.c.bf16 %v7464_v40, %v7464_v40  ;;  %v1125_v18 = vpack.c.bf16 %v7454_v28, %v7454_v28  ;;  %v1941_v31 = vsel %vm1312_vm2, %v937_v7, 0  ;;  %v6947_v40 = vld [vmem:[%s7243_s17 + $0x68] sm:$0xff]   ;;  %s7086_s17 = smov 64  }
 0x324   : > { %2948 = vxpose.xlu0.c.b16.start.end [1/1] (short) (narrow) %v1118_v55, 16  ;;  %6656 = vmatpush3.bf16.xpose.msra.mxu1 %v1837_v62  ;;  %v1130_v35 = vpack.c.bf16 %v1114_v13, %v1114_v13  ;;  %v2891_v38 = vshrl.u32 %v7498_v20, 16  ;;  %v2897_v23 = vshrl.u32 %v7500_v22, 16  ;;  %v1127_v30 = vpack.c.bf16 %v7471_v52, %v7471_v52 }
 0x325   : > { %6652 = vmatmul.mubr.msk.bf16.vlgmr.msra.gmra.mxu0 %vm1312_vm2, %v6943_v54  ;;  %6657 = vmatprep.mubr.msk.bf16.mxu1 %vm7079_vm1, %v7078_v15  ;;  %v2885_v16 = vrot.slane %v2878_v12, %v7333_v1  ;;  %v1993_v29 = vsel %vm1312_vm2, %v938_v9, 0  ;;  %v939_v37 = vpack.c.bf16 %v7442_v10, %v7442_v10  ;;  %v940_v41 = vpack.c.bf16 %v7476_v49, %v7476_v49 }
 0x326   : > { %3076 = vxpose.xlu1.c.b16.start.end [1/1] (short) (narrow) %v1126_v5, 16  ;;  %6662 = vmatpush3.bf16.xpose.msra.mxu0 %v1889_v11  ;;  %v1129_v46 = vpack.c.bf16 %v7484_v63, %v7484_v63 }
 0x327   : > { %6667 = vmatprep.subr.bf16.mxu1 %v7078_v15  ;;  %6663 = vmatprep.mubr.msk.bf16.mxu0 %vm7079_vm1, %v7078_v15  ;;  %v7523_v19 = vcombine.low %v2877_v14, %v2885_v16  ;;  %v7525_v21 = vcombine.high %v2877_v14, %v2885_v16  ;;  %v2045_v47 = vsel %vm1312_vm2, %v939_v37, 0  ;;  %v2097_v10 = vsel %vm1312_vm2, %v940_v41, 0 }
 0x328   : > { %3028 = vxpose.xlu0.c.b16.start.end [1/1] (short) (narrow) %v1123_v25, 16  ;;  %6673 = vmatprep.subr.bf16.mxu0 %v7078_v15 }
 0x329   : > { %v2890_v24 = vpack.i.b16 %v7523_v19, %v7498_v20  ;;  %v2892_v26 = vshrl.u32 %v7523_v19, 16  ;;  %v2896_v27 = vpack.i.b16 %v7525_v21, %v7500_v22  ;;  %v2898_v28 = vshrl.u32 %v7525_v21, 16 }
 0x32a   : > { %3108 = vxpose.xlu1.c.b16.start.end [1/1] (short) (narrow) %v1128_v6, 16 }
 0x32b   : > { %6658 = vmatmul.mubr.msk.bf16.vlgmr.msra.gmra.mxu1 %vm1312_vm2, %v6944_v0  ;;  %v7543_v32 = vpack.i.b16 %v2892_v26, %v2891_v38  ;;  %v7545_v33 = vpack.i.b16 %v2898_v28, %v2897_v23 }
 0x32c   : > { %3060 = vxpose.xlu0.c.b16.start.end [1/1] (short) (narrow) %v1125_v18, 16  ;;  %6668 = vmatpush3.bf16.xpose.msra.mxu1 %v1941_v31 }
 0x32d   : > { %6664 = vmatmul.mubr.msk.bf16.vlgmr.msra.gmra.mxu0 %vm1312_vm2, %v6945_v17  ;;  %6669 = vmatprep.mubr.msk.bf16.mxu1 %vm7079_vm1, %v7078_v15 }
 0x32e   : > { %3140 = vxpose.xlu1.c.b16.start.end [1/1] (short) (narrow) %v1130_v35, 16  ;;  %6674 = vmatpush3.bf16.xpose.msra.mxu0 %v1993_v29 }
 0x32f   : > { %6679 = vmatprep.subr.bf16.mxu1 %v7078_v15  ;;  %6675 = vmatprep.mubr.msk.bf16.mxu0 %vm7079_vm1, %v7078_v15 }
 0x330   : > { %3092 = vxpose.xlu0.c.b16.start.end [1/1] (short) (narrow) %v1127_v30, 16  ;;  %6685 = vmatprep.subr.bf16.mxu0 %v7078_v15 }
 0x333   : > { %6670 = vmatmul.mubr.msk.bf16.vlgmr.msra.gmra.mxu1 %vm1312_vm2, %v6946_v34 }
 0x334   : > { %3124 = vxpose.xlu0.c.b16.start.end [1/1] (short) (narrow) %v1129_v46, 16  ;;  %6680 = vmatpush3.bf16.xpose.msra.mxu1 %v2045_v47 }
 0x335   : > { %6676 = vmatmul.mubr.msk.bf16.vlgmr.msra.gmra.mxu0 %vm1312_vm2, %v6947_v40  ;;  %6681 = vmatprep.mubr.msk.bf16.mxu1 %vm7079_vm1, %v7078_v15 }
 0x336   : > { %6686 = vmatpush3.bf16.xpose.msra.mxu0 %v2097_v10  ;;  %6687 = vmatprep.mubr.msk.bf16.mxu0 %vm7079_vm1, %v7078_v15 }
 0x337   : > { %6691 = vmatprep.subr.bf16.mxu1 %v7078_v15  ;;  %6697 = vmatprep.subr.bf16.mxu0 %v7078_v15 }
 0x33b   : > { %6682 = vmatmul.mubr.msk.bf16.vlgmr.msra.gmra.mxu1 %vm1312_vm2, %v6948_v48 }
 0x33c   : > { %6693 = vmatprep.mubr.msk.bf16.mxu1 %vm7079_vm1, %v7078_v15 }
 0x33d   : > { %6688 = vmatmul.mubr.msk.bf16.vlgmr.msra.gmra.mxu0 %vm1312_vm2, %v6949_v51 }
 0x33e   : > { %6699 = vmatprep.mubr.msk.bf16.mxu0 %vm7079_vm1, %v7078_v15 }
 0x376   : > { %v2908_v52 = vpop.trf.xlu0 }
 0x378   : > { %v2924_v53 = vpop.trf.xlu1 }
 0x37a   : > { %v2940_v49 = vpop.trf.xlu0 }
 0x37c   : > { %v2988_v54 = vpop.trf.xlu1 }
 0x37d   : > { %v3224_v11 = vcombine.low %v2924_v53, %v2988_v54 }
 0x37e   : > { %v2972_v56 = vpop.trf.xlu0 }
 0x37f   : > { %v3156_v7 = vcombine.low %v2908_v52, %v2972_v56  ;;  %v3231_v16 = vrot.slane %v3224_v11, %v7327_v59 }
 0x380   : > { %v3020_v58 = vpop.trf.xlu1 }
 0x381   : > { %v3163_v35 = vrot.slane %v3156_v7, %v7327_v59 }
 0x382   : > { %v3004_v55 = vpop.trf.xlu0 }
 0x383   : > { %v3164_v25 = vcombine.low %v2940_v49, %v3004_v55 }
 0x384   : > { %v3052_v60 = vpop.trf.xlu1 }
 0x385   : > { %v3171_v17 = vrot.slane %v3164_v25, %v7327_v59 }
 0x386   : > { %v2956_v61 = vpop.trf.xlu0 }
 0x387   : > { %v3232_v5 = vcombine.low %v2956_v61, %v3020_v58  ;;  %v3188_v26 = vcombine.low %v3163_v35, %v3171_v17  ;;  %v3189_v41 = vcombine.high %v3163_v35, %v3171_v17 }
 0x388   : > { %v3084_v62 = vpop.trf.xlu1 }
 0x389   : > { %v3239_v13 = vrot.slane %v3232_v5, %v7327_v59  ;;  %v3196_v47 = vrot.slane %v3188_v26, %v7333_v1  ;;  %v3203_v54 = vrot.slane %v3189_v41, %v7333_v1 }
 0x38a   : > { %v3036_v63 = vpop.trf.xlu0 }
 0x38b   : > { %v3256_v38 = vcombine.low %v3231_v16, %v3239_v13  ;;  %v3257_v51 = vcombine.high %v3231_v16, %v3239_v13 }
 0x38c   : > { %v3116_v2 = vpop.trf.xlu1 }
 0x38d   : > { %v3240_v8 = vcombine.low %v3052_v60, %v3116_v2  ;;  %v3264_v40 = vrot.slane %v3256_v38, %v7333_v1 }
 0x38e   : > { %v3068_v4 = vpop.trf.xlu0 }
 0x38f   : > { %v3247_v14 = vrot.slane %v3240_v8, %v7327_v59 }
 0x390   : > { %v3148_v3 = vpop.trf.xlu1 }
 0x391   : > { %v3248_v12 = vcombine.low %v3084_v62, %v3148_v3 }
 0x392   : > { %v3100_v0 = vpop.trf.xlu0 }
 0x393   : > { %v3255_v6 = vrot.slane %v3248_v12, %v7327_v59  ;;  %v3172_v18 = vcombine.low %v3036_v63, %v3100_v0 }
 0x395   : > { %v3272_v9 = vcombine.low %v3247_v14, %v3255_v6  ;;  %v3179_v28 = vrot.slane %v3172_v18, %v7327_v59  ;;  %v3273_v46 = vcombine.high %v3247_v14, %v3255_v6  ;;  %v7601_v18 = vpop.f32.mrf.mxu1 }
 0x396   : > { %v3132_v31 = vpop.trf.xlu0 }
 0x397   : > { %v3180_v23 = vcombine.low %v3068_v4, %v3132_v31  ;;  %v3280_v30 = vrot.slane %v3272_v9, %v7333_v1  ;;  %v3287_v56 = vrot.slane %v3273_v46, %v7333_v1  ;;  %v3271_v4 = vrot.slane %v3257_v51, %v7333_v1  ;;  %v7603_v31 = vpop.f32.mrf.mxu0  ;;  %v6599_v35 = vpop.f32.mrf.mxu1 }
 0x399   : > { %v3187_v29 = vrot.slane %v3180_v23, %v7327_v59  ;;  %v3288_v48 = vcombine.low %v3264_v40, %v3280_v30  ;;  %v3289_v61 = vcombine.high %v3264_v40, %v3280_v30  ;;  %v3290_v3 = vcombine.low %v3271_v4, %v3287_v56  ;;  %v7605_v38 = vpop.f32.mrf.mxu1 }
 0x39a   : > { %v3291_v13 = vcombine.high %v3271_v4, %v3287_v56 }
 0x39b   : > { %v3204_v34 = vcombine.low %v3179_v28, %v3187_v29  ;;  %v3205_v37 = vcombine.high %v3179_v28, %v3187_v29  ;;  %v3297_v60 = vshrl.u32 %v3288_v48, 16  ;;  %v3305_v8 = vshrl.u32 %v3289_v61, 16 }
 0x39c   : > { %v3313_v7 = vshrl.u32 %v3290_v3, 16  ;;  %v3321_v17 = vshrl.u32 %v3291_v13, 16 }
 0x39d   : > { %v3212_v10 = vrot.slane %v3204_v34, %v7333_v1  ;;  %v3219_v49 = vrot.slane %v3205_v37, %v7333_v1 }
 0x39f   : > { %v3220_v52 = vcombine.low %v3196_v47, %v3212_v10  ;;  %v3221_v53 = vcombine.high %v3196_v47, %v3212_v10  ;;  %v3222_v2 = vcombine.low %v3203_v54, %v3219_v49  ;;  %v3223_v12 = vcombine.high %v3203_v54, %v3219_v49 }
 0x3a1   : > { %v3294_v58 = vpack.i.b16 %v3288_v48, %v3220_v52  ;;  %v3296_v55 = vshrl.u32 %v3220_v52, 16  ;;  %v3304_v63 = vshrl.u32 %v3221_v53, 16  ;;  %v3302_v5 = vpack.i.b16 %v3289_v61, %v3221_v53 }
 0x3a2   : > { %v3312_v25 = vshrl.u32 %v3222_v2, 16  ;;  %v3310_v0 = vpack.i.b16 %v3290_v3, %v3222_v2  ;;  %v3320_v6 = vshrl.u32 %v3223_v12, 16  ;;  %v3318_v16 = vpack.i.b16 %v3291_v13, %v3223_v12 }
 0x3a3   : > { %3324 = vxpose.xlu0.c.b16.start.end [1/1] (short) (narrow) %v3294_v58, 16  ;;  %v3298_v62 = vpack.i.b16 %v3297_v60, %v3296_v55  ;;  %v3306_v11 = vpack.i.b16 %v3305_v8, %v3304_v63 }
 0x3a4   : > { %v3314_v14 = vpack.i.b16 %v3313_v7, %v3312_v25  ;;  %v3322_v9 = vpack.i.b16 %v3321_v17, %v3320_v6 }
 0x3a5   : > { %3340 = vxpose.xlu1.c.b16.start.end [1/1] (short) (narrow) %v3298_v62, 16 }
 0x3a7   : > { %3356 = vxpose.xlu0.c.b16.start.end [1/1] (short) (narrow) %v3302_v5, 16 }
 0x3a9   : > { %3372 = vxpose.xlu1.c.b16.start.end [1/1] (short) (narrow) %v3306_v11, 16 }
 0x3ab   : > { %3388 = vxpose.xlu0.c.b16.start.end [1/1] (short) (narrow) %v3310_v0, 16 }
 0x3ad   : > { %3404 = vxpose.xlu1.c.b16.start.end [1/1] (short) (narrow) %v3314_v14, 16 }
 0x3af   : > { %3420 = vxpose.xlu0.c.b16.start.end [1/1] (short) (narrow) %v3318_v16, 16 }
 0x3b1   : > { %3436 = vxpose.xlu1.c.b16.start.end [1/1] (short) (narrow) %v3322_v9, 16 }
 0x3b5   : > { %1133 = vrot.lane.b32.xlu1 %v7288_v39, %s7086_s17  ;;  %v6605_v39 = vpop.f32.mrf.mxu0 }
 0x3b8   : > { %1131 = vrot.lane.b32.xlu0 %v7282_v36, %s7086_s17  ;;  %v7607_v36 = vpop.f32.mrf.mxu0 }
 0x3b9   : > { %1135 = vrot.lane.b32.xlu1 %v7306_v43, %s7086_s17  ;;  %v6600_v43 = vpop.f32.mrf.mxu1 }
 0x3bb   : > { %v7609_v23 = vpop.f32.mrf.mxu1 }
 0x3bc   : > { %1139 = vrot.lane.b32.xlu0 %v7304_v42, %s7086_s17  ;;  %v6606_v42 = vpop.f32.mrf.mxu0 }
 0x3bd   : > { %1137 = vrot.lane.b32.xlu1 %v7311_v45, %s7086_s17 }
 0x3be   : > { %v7611_v45 = vpop.f32.mrf.mxu0 }
 0x3c0   : > { %1143 = vrot.lane.b32.xlu0 %v7309_v44, %s7086_s17  ;;  %v6611_v44 = vpop.f32.mrf.mxu1 }
 0x3c1   : > { %1141 = vrot.lane.b32.xlu1 %v7315_v50, %s7086_s17  ;;  %v6617_v50 = vpop.f32.mrf.mxu0 }
 0x3c2   : > { %v7613_v26 = vpop.f32.mrf.mxu1 }
 0x3c4   : > { %v6612_v28 = vpop.f32.mrf.mxu1 }
 0x3c5   : > { %1145 = vrot.lane.b32.xlu1 %v7322_v57, %s7086_s17  ;;  %v7615_v57 = vpop.f32.mrf.mxu0 }
 0x3c6   : > { %v7617_v30 = vpop.f32.mrf.mxu1 }
 0x3c7   : > { %v6618_v29 = vpop.f32.mrf.mxu0 }
 0x3c8   : > { %v6623_v37 = vpop.f32.mrf.mxu1 }
 0x3c9   : > { %v7619_v34 = vpop.f32.mrf.mxu0 }
 0x3ca   : > { %v7621_v41 = vpop.f32.mrf.mxu1 }
 0x3cb   : > { %v6629_v40 = vpop.f32.mrf.mxu0 }
 0x3cc   : > { %v6624_v47 = vpop.f32.mrf.mxu1 }
 0x3cd   : > { %v7623_v46 = vpop.f32.mrf.mxu0 }
 0x3ce   : > { %v7625_v48 = vpop.f32.mrf.mxu1 }
 0x3cf   : > { %v6630_v10 = vpop.f32.mrf.mxu0 }
 0x3d0   : > { %v6635_v52 = vpop.f32.mrf.mxu1 }
 0x3d1   : > { %v7627_v51 = vpop.f32.mrf.mxu0 }
 0x3d2   : > { %v7629_v49 = vpop.f32.mrf.mxu1 }
 0x3d3   : > { %v6641_v53 = vpop.f32.mrf.mxu0 }
 0x3d4   : > { %v6636_v56 = vpop.f32.mrf.mxu1 }
 0x3d5   : > { %v7631_v54 = vpop.f32.mrf.mxu0 }
 0x3d7   : > { %v6642_v58 = vpop.f32.mrf.mxu0 }
 0x3e3   : > { %v7633_v55 = vpop.f32.mrf.mxu1 }
 0x3e5   : > { %v7635_v60 = vpop.f32.mrf.mxu0  ;;  %v6647_v61 = vpop.f32.mrf.mxu1 }
 0x3e7   : > { %v6653_v62 = vpop.f32.mrf.mxu0  ;;  %v7637_v63 = vpop.f32.mrf.mxu1 }
 0x3e9   : > { %v7639_v2 = vpop.f32.mrf.mxu0  ;;  %v6648_v4 = vpop.f32.mrf.mxu1 }
 0x3eb   : > { %v6654_v5 = vpop.f32.mrf.mxu0  ;;  %v7641_v8 = vpop.f32.mrf.mxu1 }
 0x3ed   : > { %v7643_v3 = vpop.f32.mrf.mxu0  ;;  %v6659_v11 = vpop.f32.mrf.mxu1 }
 0x3ef   : > { %v6665_v25 = vpop.f32.mrf.mxu0  ;;  %v7645_v12 = vpop.f32.mrf.mxu1 }
 0x3f1   : > { %v7647_v0 = vpop.f32.mrf.mxu0  ;;  %v6660_v7 = vpop.f32.mrf.mxu1 }
 0x3f3   : > { %v6666_v13 = vpop.f32.mrf.mxu0  ;;  %v7649_v14 = vpop.f32.mrf.mxu1 }
 0x3f5   : > { %v7651_v6 = vpop.f32.mrf.mxu0  ;;  %v6671_v16 = vpop.f32.mrf.mxu1 }
 0x3f7   : > { %v6677_v17 = vpop.f32.mrf.mxu0  ;;  %v7653_v35 = vpop.f32.mrf.mxu1 }
 0x3f9   : > { %v7655_v39 = vpop.f32.mrf.mxu0  ;;  %v6672_v42 = vpop.f32.mrf.mxu1 }
 0x3fb   : > { %v6678_v44 = vpop.f32.mrf.mxu0  ;;  %v7657_v28 = vpop.f32.mrf.mxu1 }
 0x3fd   : > { %v7659_v29 = vpop.f32.mrf.mxu0  ;;  %v6683_v40 = vpop.f32.mrf.mxu1 }
 0x3ff   : > { %v6689_v47 = vpop.f32.mrf.mxu0  ;;  %v7661_v52 = vpop.f32.mrf.mxu1 }
 0x401   : > { %v7663_v56 = vpop.f32.mrf.mxu0  ;;  %v6684_v61 = vpop.f32.mrf.mxu1 }
 0x403   : > { %v6690_v4 = vpop.f32.mrf.mxu0 }
 0x405   : > { %v3332_v9 = vpop.trf.xlu0 }
 0x407   : > { %v3348_v43 = vpop.trf.xlu1 }
 0x409   : > { %v3364_v50 = vpop.trf.xlu0 }
 0x40b   : > { %v3380_v37 = vpop.trf.xlu1 }
 0x40d   : > { %v3396_v10 = vpop.trf.xlu0 }
 0x40e   : > { %v3452_v53 = vcombine.low %v3332_v9, %v3396_v10  ;;  %v7087_v10 = vmov 0  }
 0x40f   : > { %v3412_v58 = vpop.trf.xlu1 }
 0x410   : > { %v3477_v62 = vcombine.low %v3348_v43, %v3412_v58  ;;  %v3459_v11 = vrot.slane %v3452_v53, %v7327_v59 }
 0x411   : > { %v3428_v5 = vpop.trf.xlu0 }
 0x412   : > { %v3460_v25 = vcombine.low %v3364_v50, %v3428_v5  ;;  %v3484_v13 = vrot.slane %v3477_v62, %v7327_v59 }
 0x413   : > { %v3444_v7 = vpop.trf.xlu1 }
 0x414   : > { %v3485_v16 = vcombine.low %v3380_v37, %v3444_v7  ;;  %v3467_v17 = vrot.slane %v3460_v25, %v7327_v59 }
 0x416   : > { %v3492_v42 = vrot.slane %v3485_v16, %v7327_v59  ;;  %v3468_v44 = vcombine.low %v3459_v11, %v3467_v17 }
 0x418   : > { %v3493_v9 = vcombine.low %v3484_v13, %v3492_v42  ;;  %v3475_v40 = vrot.slane %v3468_v44, %v7333_v1 }
 0x41a   : > { %v3500_v47 = vrot.slane %v3493_v9, %v7333_v1  ;;  %v3505_v43 = vshrl.u32 %v3475_v40, 16  ;;  %v3476_v58 = vcombine.high %v3475_v40, %v7087_v10 }
 0x41c   : > { %v3504_v50 = vpack.i.b16 %v3500_v47, %v3475_v40  ;;  %v3506_v53 = vshrl.u32 %v3500_v47, 16  ;;  %v3501_v61 = vcombine.high %v3500_v47, %v7087_v10  ;;  %v3511_v37 = vshrl.u32 %v3476_v58, 16 }
 0x41e   : > { %v3519_v62 = vsel %vm3517_vm3, %v3504_v50, 0  ;;  %v3507_v4 = vpack.i.b16 %v3506_v53, %v3505_v43  ;;  %v3510_v5 = vpack.i.b16 %v3501_v61, %v3476_v58  ;;  %v3512_v11 = vshrl.u32 %v3501_v61, 16 }
 0x41f   : > { %6692 = vmatpush3.bf16.msra.mxu1 %v3519_v62 }
 0x420   : > { %v3566_v25 = vsel %vm3517_vm3, %v3507_v4, 0  ;;  %6703 = vmatprep.subr.bf16.mxu1 %v7078_v15  ;;  %v3613_v7 = vsel %vm3517_vm3, %v3510_v5, 0  ;;  %v3513_v13 = vpack.i.b16 %v3512_v11, %v3511_v37 }
 0x421   : > { %6698 = vmatpush3.bf16.msra.mxu0 %v3566_v25 }
 0x422   : > { %6694 = vmatmul.mubr.msk.bf16.vlgmr.msra.gmra.mxu1 %vm1312_vm2, %v2890_v24  ;;  %6709 = vmatprep.subr.bf16.mxu0 %v7078_v15  ;;  %v3660_v16 = vsel %vm3517_vm3, %v3513_v13, 0 }
 0x423   : > { %6704 = vmatpush3.bf16.msra.mxu1 %v3613_v7  ;;  %6705 = vmatprep.mubr.msk.bf16.mxu1 %vm7079_vm1, %v7078_v15 }
 0x424   : > { %6700 = vmatmul.mubr.msk.bf16.vlgmr.msra.gmra.mxu0 %vm1312_vm2, %v7543_v32  ;;  %6715 = vmatprep.subr.bf16.mxu1 %v7078_v15 }
 0x425   : > { %6710 = vmatpush3.bf16.msra.mxu0 %v3660_v16  ;;  %6711 = vmatprep.mubr.msk.bf16.mxu0 %vm7079_vm1, %v7078_v15 }
 0x426   : > { %6721 = vmatprep.subr.bf16.mxu0 %v7078_v15 }
 0x427   : > { %v1134_v20 = vpop.permute.xlu1 %1133 }
 0x42a   : > { %6706 = vmatmul.mubr.msk.bf16.vlgmr.msra.gmra.mxu1 %vm1312_vm2, %v2896_v27  ;;  %v1132_v19 = vpop.permute.xlu0 %1131 }
 0x42b   : > { %v1136_v24 = vpop.permute.xlu1 %1135  ;;  %6717 = vmatprep.mubr.msk.bf16.mxu1 %vm7079_vm1, %v7078_v15 }
 0x42c   : > { %6712 = vmatmul.mubr.msk.bf16.vlgmr.msra.gmra.mxu0 %vm1312_vm2, %v7545_v33 }
 0x42d   : > { %6723 = vmatprep.mubr.msk.bf16.mxu0 %vm7079_vm1, %v7078_v15 }
 0x42e   : > { %v1140_v32 = vpop.permute.xlu0 %1139 }
 0x42f   : > { %v1138_v17 = vpop.permute.xlu1 %1137  ;;  %v1155_v42 = vcombine.low %v1132_v19, %v1140_v32  ;;  %v1156_v44 = vcombine.high %v1132_v19, %v1140_v32 }
 0x431   : > { %v1163_v47 = vrot.slane %v1155_v42, %v7327_v59  ;;  %v1170_v43 = vrot.slane %v1156_v44, %v7327_v59 }
 0x432   : > { %v1144_v9 = vpop.permute.xlu0 %1143 }
 0x433   : > { %v1171_v40 = vcombine.low %v1136_v24, %v1144_v9  ;;  %v1172_v22 = vcombine.high %v1136_v24, %v1144_v9  ;;  %v1142_v21 = vpop.permute.xlu1 %1141 }
 0x434   : > { %v1224_v27 = vcombine.high %v1134_v20, %v1142_v21  ;;  %v1223_v61 = vcombine.low %v1134_v20, %v1142_v21 }
 0x435   : > { %v1179_v58 = vrot.slane %v1171_v40, %v7327_v59  ;;  %v1186_v33 = vrot.slane %v1172_v22, %v7327_v59 }
 0x436   : > { %v7708_v13 = vrot.slane %v1224_v27, %v7327_v59  ;;  %v1231_v24 = vrot.slane %v1223_v61, %v7327_v59 }
 0x437   : > { %v1187_v50 = vcombine.low %v1163_v47, %v1179_v58  ;;  %v1203_v53 = vcombine.low %v1170_v43, %v1186_v33  ;;  %v1146_v37 = vpop.permute.xlu1 %1145  ;;  %v1188_v62 = vcombine.high %v1163_v47, %v1179_v58  ;;  %v1204_v11 = vcombine.high %v1170_v43, %v1186_v33 }
 0x438   : > { %v1239_v4 = vcombine.low %v1138_v17, %v1146_v37  ;;  %v1240_v5 = vcombine.high %v1138_v17, %v1146_v37 }
 0x439   : > { %v1195_v25 = vrot.slane %v1187_v50, %v7333_v1  ;;  %v1211_v7 = vrot.slane %v1203_v53, %v7333_v1  ;;  %v1202_v17 = vrot.slane %v1188_v62, %v7333_v1  ;;  %v1218_v22 = vrot.slane %v1204_v11, %v7333_v1 }
 0x43a   : > { %v1247_v16 = vrot.slane %v1239_v4, %v7327_v59  ;;  %v7712_v19 = vrot.slane %v1240_v5, %v7327_v59 }
 0x43b   : > { %v1291_v20 = vpack.c.bf16 %v1195_v25, %v1195_v25  ;;  %v1219_v32 = vcombine.high %v1195_v25, %v7078_v15  ;;  %v1221_v40 = vcombine.high %v1211_v7, %v7078_v15  ;;  %v1293_v21 = vpack.c.bf16 %v1202_v17, %v1202_v17 }
 0x43c   : > { %v1271_v42 = vcombine.low %v7708_v13, %v7712_v19  ;;  %v1255_v44 = vcombine.low %v1231_v24, %v1247_v16  ;;  %v1220_v27 = vcombine.high %v1202_v17, %v7078_v15  ;;  %v1272_v47 = vcombine.high %v7708_v13, %v7712_v19 }
 0x43d   : > { %3804 = vxpose.xlu0.c.b16.start.end [1/1] (short) (narrow) %v1291_v20, 16  ;;  %v1292_v9 = vpack.c.bf16 %v1219_v32, %v1219_v32  ;;  %v1296_v43 = vpack.c.bf16 %v1221_v40, %v1221_v40  ;;  %v1222_v58 = vcombine.high %v1218_v22, %v7078_v15  ;;  %v1295_v37 = vpack.c.bf16 %v1211_v7, %v1211_v7 }
 0x43e   : > { %v1263_v33 = vrot.slane %v1255_v44, %v7333_v1  ;;  %v1294_v50 = vpack.c.bf16 %v1220_v27, %v1220_v27  ;;  %v1297_v4 = vpack.c.bf16 %v1218_v22, %v1218_v22  ;;  %v1256_v5 = vcombine.high %v1231_v24, %v1247_v16 }
 0x43f   : > { %3820 = vxpose.xlu1.c.b16.start.end [1/1] (short) (narrow) %v1292_v9, 16  ;;  %v1298_v53 = vpack.c.bf16 %v1222_v58, %v1222_v58 }
 0x440   : > { %v1287_v61 = vcombine.high %v1263_v33, %v7078_v15  ;;  %v1299_v11 = vpack.c.bf16 %v1263_v33, %v1263_v33  ;;  %v1270_v25 = vrot.slane %v1256_v5, %v7333_v1 }
 0x441   : > { %3836 = vxpose.xlu0.c.b16.start.end [1/1] (short) (narrow) %v1293_v21, 16 }
 0x442   : > { %v1300_v62 = vpack.c.bf16 %v1287_v61, %v1287_v61  ;;  %v1301_v20 = vpack.c.bf16 %v1270_v25, %v1270_v25 }
 0x443   : > { %3884 = vxpose.xlu1.c.b16.start.end [1/1] (short) (narrow) %v1296_v43, 16 }
 0x445   : > { %3852 = vxpose.xlu0.c.b16.start.end [1/1] (short) (narrow) %v1294_v50, 16 }
 0x447   : > { %3916 = vxpose.xlu1.c.b16.start.end [1/1] (short) (narrow) %v1298_v53, 16 }
 0x449   : > { %3868 = vxpose.xlu0.c.b16.start.end [1/1] (short) (narrow) %v1295_v37, 16 }
 0x44b   : > { %3948 = vxpose.xlu1.c.b16.start.end [1/1] (short) (narrow) %v1300_v62, 16 }
 0x44d   : > { %3900 = vxpose.xlu0.c.b16.start.end [1/1] (short) (narrow) %v1297_v4, 16 }
 0x451   : > { %3932 = vxpose.xlu0.c.b16.start.end [1/1] (short) (narrow) %v1299_v11, 16 }
 0x455   : > { %3964 = vxpose.xlu0.c.b16.start.end [1/1] (short) (narrow) %v1301_v20, 16  ;;  %2172 = vxpose.xlu1.b32.start [1/2] (short) (narrow) %v7603_v31, 8 }
 0x459   : > { %2140 = vxpose.xlu0.b32.start [1/2] (short) (narrow) %v7601_v18, 8  ;;  %2173 = vxpose.xlu1.b32.end [2/2] (short) (narrow) %v7607_v36, 8 }
 0x45d   : > { %2141 = vxpose.xlu0.b32.end [2/2] (short) (narrow) %v7605_v38, 8  ;;  %2236 = vxpose.xlu1.b32.start [1/2] (short) (narrow) %v7611_v45, 8 }
 0x461   : > { %2204 = vxpose.xlu0.b32.start [1/2] (short) (narrow) %v7609_v23, 8  ;;  %2237 = vxpose.xlu1.b32.end [2/2] (short) (narrow) %v7615_v57, 8 }
 0x465   : > { %2205 = vxpose.xlu0.b32.end [2/2] (short) (narrow) %v7613_v26, 8  ;;  %2300 = vxpose.xlu1.b32.start [1/2] (short) (narrow) %v7619_v34, 8  ;;  %v1288_v26 = vcombine.high %v1270_v25, %v7078_v15  ;;  %v647_v25 = vld [vmem:[%s7798_s21] sm:$0xff] }
 0x466   : > { %vm649_vm4 = vcmp.gt.f32.partialorder %v647_v25, 0.0 }
 0x469   : > { %2268 = vxpose.xlu0.b32.start [1/2] (short) (narrow) %v7617_v30, 8  ;;  %2301 = vxpose.xlu1.b32.end [2/2] (short) (narrow) %v7623_v46, 8 }
 0x46d   : > { %2269 = vxpose.xlu0.b32.end [2/2] (short) (narrow) %v7621_v41, 8  ;;  %2364 = vxpose.xlu1.b32.start [1/2] (short) (narrow) %v7627_v51, 8  ;;  %v1302_v51 = vpack.c.bf16 %v1288_v26, %v1288_v26 }
 0x471   : > { %2332 = vxpose.xlu0.b32.start [1/2] (short) (narrow) %v7625_v48, 8  ;;  %2365 = vxpose.xlu1.b32.end [2/2] (short) (narrow) %v7631_v54, 8 }
 0x475   : > { %2333 = vxpose.xlu0.b32.end [2/2] (short) (narrow) %v7629_v49, 8  ;;  %2428 = vxpose.xlu1.b32.start [1/2] (short) (narrow) %v7635_v60, 8 }
 0x479   : > { %2396 = vxpose.xlu0.b32.start [1/2] (short) (narrow) %v7633_v55, 8  ;;  %2429 = vxpose.xlu1.b32.end [2/2] (short) (narrow) %v7639_v2, 8 }
 0x47d   : > { %2397 = vxpose.xlu0.b32.end [2/2] (short) (narrow) %v7637_v63, 8  ;;  %2492 = vxpose.xlu1.b32.start [1/2] (short) (narrow) %v7643_v3, 8 }
 0x481   : > { %2460 = vxpose.xlu0.b32.start [1/2] (short) (narrow) %v7641_v8, 8  ;;  %2493 = vxpose.xlu1.b32.end [2/2] (short) (narrow) %v7647_v0, 8 }
 0x485   : > { %2461 = vxpose.xlu0.b32.end [2/2] (short) (narrow) %v7645_v12, 8  ;;  %2556 = vxpose.xlu1.b32.start [1/2] (short) (narrow) %v7651_v6, 8 }
 0x489   : > { %2524 = vxpose.xlu0.b32.start [1/2] (short) (narrow) %v7649_v14, 8  ;;  %2557 = vxpose.xlu1.b32.end [2/2] (short) (narrow) %v7655_v39, 8 }
 0x48d   : > { %2525 = vxpose.xlu0.b32.end [2/2] (short) (narrow) %v7653_v35, 8  ;;  %2620 = vxpose.xlu1.b32.start [1/2] (short) (narrow) %v7659_v29, 8 }
 0x491   : > { %2588 = vxpose.xlu0.b32.start [1/2] (short) (narrow) %v7657_v28, 8  ;;  %2621 = vxpose.xlu1.b32.end [2/2] (short) (narrow) %v7663_v56, 8 }
 0x495   : > { %2589 = vxpose.xlu0.b32.end [2/2] (short) (narrow) %v7661_v52, 8 }
 0x49f   : > { %v3812_v18 = vpop.trf.xlu0 }
 0x4a1   : > { %v3828_v31 = vpop.trf.xlu1 }
 0x4a3   : > { %v3844_v38 = vpop.trf.xlu0 }
 0x4a5   : > { %v3892_v36 = vpop.trf.xlu1 }
 0x4a6   : > { %v4128_v23 = vcombine.low %v3828_v31, %v3892_v36 }
 0x4a7   : > { %v3860_v45 = vpop.trf.xlu0 }
 0x4a8   : > { %v7762_v30 = vrot.slane %v4128_v23, %v7327_v59 }
 0x4a9   : > { %v3924_v57 = vpop.trf.xlu1 }
 0x4aa   : > { %v4136_v34 = vcombine.low %v3860_v45, %v3924_v57 }
 0x4ab   : > { %v3876_v41 = vpop.trf.xlu0 }
 0x4ac   : > { %v4060_v46 = vcombine.low %v3812_v18, %v3876_v41  ;;  %v7765_v48 = vrot.slane %v4136_v34, %v7327_v59 }
 0x4ad   : > { %v7783_v0 = vpop.trf.xlu1 }
 0x4ae   : > { %v4160_v49 = vcombine.low %v7762_v30, %v7765_v48  ;;  %v4161_v54 = vcombine.high %v7762_v30, %v7765_v48  ;;  %v7772_v60 = vrot.slane %v4060_v46, %v7327_v59 }
 0x4af   : > { %3980 = vxpose.xlu1.c.b16.start.end [1/1] (short) (narrow) %v1302_v51, 16  ;;  %v3908_v55 = vpop.trf.xlu0 }
 0x4b0   : > { %v4068_v63 = vcombine.low %v3844_v38, %v3908_v55  ;;  %v7088_v55 = vmov -1e+09  }
 0x4b2   : > { %v7775_v2 = vrot.slane %v4068_v63, %v7327_v59  ;;  %v651_v63 = vsel %vm649_vm4, 0.0, %v7088_v55 }
 0x4b3   : > { %v7781_v12 = vpop.trf.xlu0 }
 0x4b4   : > { %v4092_v8 = vcombine.low %v7772_v60, %v7775_v2  ;;  %v4093_v3 = vcombine.high %v7772_v60, %v7775_v2 }
 0x4b7   : > { %v7785_v14 = vpop.trf.xlu0 }
 0x4d1   : > { %v2188_v6 = vpop.trf.xlu1 }
 0x4d5   : > { %v2156_v35 = vpop.trf.xlu0 }
 0x4d9   : > { %v2252_v39 = vpop.trf.xlu1 }
 0x4da   : > { %v2660_v24 = vcombine.low %v2188_v6, %v2252_v39 }
 0x4dc   : > { %v2667_v27 = vrot.slane %v2660_v24, %v7327_v59 }
 0x4dd   : > { %v2220_v28 = vpop.trf.xlu0 }
 0x4de   : > { %v2652_v16 = vcombine.low %v2156_v35, %v2220_v28 }
 0x4e0   : > { %v2659_v21 = vrot.slane %v2652_v16, %v7327_v59 }
 0x4e1   : > { %v2316_v52 = vpop.trf.xlu1 }
 0x4e2   : > { %v3555_v29 = vpop.f32.mrf.mxu1  ;;  %v2684_v37 = vcombine.low %v2659_v21, %v2667_v27  ;;  %v2685_v20 = vcombine.high %v2659_v21, %v2667_v27 }
 0x4e4   : > { %v6695_v56 = vpop.f32.mrf.mxu1  ;;  %v3602_v7 = vpop.f32.mrf.mxu0  ;;  %v2692_v36 = vrot.slane %v2684_v37, %v7333_v1  ;;  %v2699_v57 = vrot.slane %v2685_v20, %v7333_v1 }
 0x4e5   : > { %v2284_v44 = vpop.trf.xlu0 }
 0x4e6   : > { %v7787_v32 = vpop.f32.mrf.mxu1  ;;  %v6701_v17 = vpop.f32.mrf.mxu0 }
 0x4e8   : > { %v6696_v9 = vpop.f32.mrf.mxu1  ;;  %v7789_v40 = vpop.f32.mrf.mxu0 }
 0x4e9   : > { %v2380_v22 = vpop.trf.xlu1 }
 0x4ea   : > { %v6702_v43 = vpop.f32.mrf.mxu0  ;;  %v3649_v58 = vpop.f32.mrf.mxu1  ;;  %v2676_v33 = vcombine.low %v2316_v52, %v2380_v22 }
 0x4ec   : > { %v6707_v50 = vpop.f32.mrf.mxu1  ;;  %v3696_v53 = vpop.f32.mrf.mxu0  ;;  %v2683_v4 = vrot.slane %v2676_v33, %v7327_v59 }
 0x4ed   : > { %v2348_v61 = vpop.trf.xlu0 }
 0x4ee   : > { %v2668_v62 = vcombine.low %v2284_v44, %v2348_v61  ;;  %v7801_v5 = vpop.f32.mrf.mxu1  ;;  %v6713_v11 = vpop.f32.mrf.mxu0 }
 0x4f0   : > { %v2675_v18 = vrot.slane %v2668_v62, %v7327_v59  ;;  %v6708_v31 = vpop.f32.mrf.mxu1  ;;  %v7805_v38 = vpop.f32.mrf.mxu0 }
 0x4f1   : > { %v2444_v6 = vpop.trf.xlu1 }
 0x4f2   : > { %v2700_v23 = vcombine.low %v2675_v18, %v2683_v4  ;;  %v2701_v45 = vcombine.high %v2675_v18, %v2683_v4  ;;  %v6714_v26 = vpop.f32.mrf.mxu0 }
 0x4f4   : > { %v2708_v34 = vrot.slane %v2700_v23, %v7333_v1  ;;  %v2715_v41 = vrot.slane %v2701_v45, %v7333_v1  ;;  %v648_v23 = vld [vmem:[%s7798_s21 + $0x8] sm:$0xff]  ;;  %s6492_s21 = sshll.u32 %s7200_s25, 8 }
 0x4f5   : > { %v2412_v44 = vpop.trf.xlu0  ;;  %vm650_vm6 = vcmp.gt.f32.partialorder %v648_v23, 0.0  ;;  %v4107_v23 = vrot.slane %v4093_v3, %v7333_v1 }
 0x4f6   : > { %v2716_v46 = vcombine.low %v2692_v36, %v2708_v34  ;;  %v2717_v51 = vcombine.high %v2692_v36, %v2708_v34  ;;  %v2718_v28 = vcombine.low %v2699_v57, %v2715_v41  ;;  %v2719_v17 = vcombine.high %v2699_v57, %v2715_v41 }
 0x4f8   : > { %v3556_v35 = vadd.f32 %v3555_v29, %v2716_v46  ;;  %v3603_v39 = vadd.f32 %v3602_v7, %v2717_v51  ;;  %v3650_v24 = vadd.f32 %v3649_v58, %v2718_v28  ;;  %v3697_v29 = vadd.f32 %v3696_v53, %v2719_v17 }
 0x4f9   : > { %v2508_v9 = vpop.trf.xlu1 }
 0x4fa   : > { %v7811_v52 = vadd.f32 %v3556_v35, %v651_v63  ;;  %v7815_v16 = vadd.f32 %v3603_v39, %v651_v63  ;;  %v7819_v21 = vadd.f32 %v3650_v24, %v651_v63  ;;  %v7823_v33 = vadd.f32 %v3697_v29, %v651_v63 }
 0x4fb   : > { %v2728_v61 = vcombine.low %v2444_v6, %v2508_v9  ;;  %v652_v35 = vsel %vm650_vm6, 0.0, %v7088_v55 }
 0x4fc   : > { %v3712_v56 = vsel %vm3711_vm5, %v7811_v52, -inf  ;;  %v3718_v22 = vsel %vm3711_vm5, %v7815_v16, -inf  ;;  %v3724_v43 = vsel %vm3711_vm5, %v7819_v21, -inf  ;;  %v3730_v37 = vsel %vm3711_vm5, %v7823_v33, -inf }
 0x4fd   : > { %3713 = vmax.xlane.f32.xlu0 %v3712_v56  ;;  %v2476_v7 = vpop.trf.xlu0  ;;  %v2735_v4 = vrot.slane %v2728_v61, %v7327_v59 }
 0x4fe   : > { %v2720_v50 = vcombine.low %v2412_v44, %v2476_v7 }
 0x500   : > { %v2727_v53 = vrot.slane %v2720_v50, %v7327_v59 }
 0x501   : > { %3719 = vmax.xlane.f32.xlu0 %v3718_v22  ;;  %v2572_v27 = vpop.trf.xlu1 }
 0x502   : > { %v2752_v18 = vcombine.low %v2727_v53, %v2735_v4  ;;  %v2753_v45 = vcombine.high %v2727_v53, %v2735_v4 }
 0x504   : > { %v2760_v34 = vrot.slane %v2752_v18, %v7333_v1  ;;  %v2767_v51 = vrot.slane %v2753_v45, %v7333_v1 }
 0x505   : > { %3725 = vmax.xlane.f32.xlu0 %v3724_v43  ;;  %v2540_v58 = vpop.trf.xlu0 }
 0x509   : > { %v2636_v62 = vpop.trf.xlu1  ;;  %3731 = vmax.xlane.f32.xlu0 %v3730_v37 }
 0x50a   : > { %v2744_v11 = vcombine.low %v2572_v27, %v2636_v62 }
 0x50c   : > { %v2751_v31 = vrot.slane %v2744_v11, %v7327_v59 }
 0x50d   : > { %v2604_v25 = vpop.trf.xlu0 }
 0x50e   : > { %v2736_v20 = vcombine.low %v2540_v58, %v2604_v25 }
 0x510   : > { %v2743_v36 = vrot.slane %v2736_v20, %v7327_v59 }
 0x512   : > { %v2768_v26 = vcombine.low %v2743_v36, %v2751_v31  ;;  %v2769_v57 = vcombine.high %v2743_v36, %v2751_v31  ;;  %v3988_v31 = vpop.trf.xlu1 }
 0x514   : > { %v2776_v41 = vrot.slane %v2768_v26, %v7333_v1  ;;  %v2783_v46 = vrot.slane %v2769_v57, %v7333_v1 }
 0x516   : > { %v2784_v63 = vcombine.low %v2760_v34, %v2776_v41  ;;  %v2785_v6 = vcombine.high %v2760_v34, %v2776_v41  ;;  %v2786_v56 = vcombine.low %v2767_v51, %v2783_v46  ;;  %v2787_v22 = vcombine.high %v2767_v51, %v2783_v46 }
 0x518   : > { %v3559_v39 = vadd.f32 %v7787_v32, %v2784_v63  ;;  %v3606_v28 = vadd.f32 %v7789_v40, %v2785_v6  ;;  %v3653_v9 = vadd.f32 %v7801_v5, %v2786_v56  ;;  %v3700_v32 = vadd.f32 %v7805_v38, %v2787_v22 }
 0x519   : > { %v1279_v5 = vrot.slane %v1271_v42, %v7333_v1  ;;  %v1286_v38 = vrot.slane %v1272_v47, %v7333_v1 }
 0x51a   : > { %v7838_v24 = vadd.f32 %v3559_v39, %v652_v35  ;;  %v7842_v44 = vadd.f32 %v3606_v28, %v652_v35  ;;  %v7847_v55 = vadd.f32 %v3653_v9, %v652_v35  ;;  %v7852_v7 = vadd.f32 %v3700_v32, %v652_v35 }
 0x51b   : > { %v1303_v43 = vpack.c.bf16 %v1279_v5, %v1279_v5  ;;  %v1305_v58 = vpack.c.bf16 %v1286_v38, %v1286_v38  ;;  %v1289_v50 = vcombine.high %v1279_v5, %v7078_v15  ;;  %v1290_v37 = vcombine.high %v1286_v38, %v7078_v15 }
 0x51c   : > { %v3715_v17 = vsel %vm3711_vm5, %v7838_v24, -inf  ;;  %v3721_v29 = vsel %vm3711_vm5, %v7842_v44, -inf  ;;  %v3727_v40 = vsel %vm3711_vm5, %v7847_v55, -inf  ;;  %v3733_v27 = vsel %vm3711_vm5, %v7852_v7, -inf }
 0x51d   : > { %3716 = vmax.xlane.f32.xlu1 %v3715_v17  ;;  %v1304_v61 = vpack.c.bf16 %v1289_v50, %v1289_v50  ;;  %v1306_v62 = vpack.c.bf16 %v1290_v37, %v1290_v37  ;;  %v4100_v28 = vrot.slane %v4092_v8, %v7333_v1 }
 0x521   : > { %3722 = vmax.xlane.f32.xlu1 %v3721_v29 }
 0x525   : > { %3728 = vmax.xlane.f32.xlu1 %v3727_v40  ;;  %v4168_v40 = vrot.slane %v4160_v49, %v7333_v1 }
 0x529   : > { %3734 = vmax.xlane.f32.xlu1 %v3733_v27 }
 0x536   : > { %3996 = vxpose.xlu0.c.b16.start.end [1/1] (short) (narrow) %v1303_v43, 16 }
 0x53a   : > { %4028 = vxpose.xlu0.c.b16.start.end [1/1] (short) (narrow) %v1305_v58, 16 }
 0x556   : > { %4012 = vxpose.xlu1.c.b16.start.end [1/1] (short) (narrow) %v1304_v61, 16 }
 0x55a   : > { %4044 = vxpose.xlu1.c.b16.start.end [1/1] (short) (narrow) %v1306_v62, 16 }
 0x586   : > { %v3714_v53 = vpop.xlane.xlu0 %3713 }
 0x587   : > { %v3736_v2 = vsub.f32 %v7811_v52, %v3714_v53 }
 0x589   : > { %v3744_v53 = vmul.f32 1.442695, %v3736_v2 }
 0x58a   : > { %v7866_v4 = vpop.xlane.xlu0 %3719 }
 0x58b   : > { %6978 = vpow2.f32 %v3744_v53 }
 0x58e   : > { %v7868_v42 = vpop.xlane.xlu0 %3725 }
 0x592   : > { %v7870_v11 = vpop.xlane.xlu0 %3731 }
 0x598   : > { %v4004_v13 = vpop.trf.xlu0 }
 0x599   : > { %v4076_v19 = vcombine.low %v7781_v12, %v4004_v13 }
 0x59b   : > { %v4083_v20 = vrot.slane %v4076_v19, %v7327_v59  ;;  %v3738_v19 = vsub.f32 %v7815_v16, %v7866_v4  ;;  %v3742_v4 = vsub.f32 %v7823_v33, %v7870_v11 }
 0x59c   : > { %v4036_v47 = vpop.trf.xlu0 }
 0x59d   : > { %v4084_v25 = vcombine.low %v7785_v14, %v4036_v47 }
 0x59f   : > { %v4091_v18 = vrot.slane %v4084_v25, %v7327_v59 }
 0x5a1   : > { %v4109_v36 = vcombine.high %v4083_v20, %v4091_v18  ;;  %v4108_v46 = vcombine.low %v4083_v20, %v4091_v18 }
 0x5a3   : > { %v4123_v45 = vrot.slane %v4109_v36, %v7333_v1  ;;  %v4116_v35 = vrot.slane %v4108_v46, %v7333_v1 }
 0x5a5   : > { %v7881_v26 = vcombine.high %v4107_v23, %v4123_v45  ;;  %v4124_v9 = vcombine.low %v4100_v28, %v4116_v35  ;;  %v4125_v22 = vcombine.high %v4100_v28, %v4116_v35  ;;  %v4126_v29 = vcombine.low %v4107_v23, %v4123_v45 }
 0x5a6   : > { %v3717_v57 = vpop.xlane.xlu1 %3716  ;;  %v3748_v23 = vmul.f32 1.442695, %v3738_v19  ;;  %v3740_v45 = vsub.f32 %v7819_v21, %v7868_v42  ;;  %v3756_v21 = vmul.f32 1.442695, %v3742_v4 }
 0x5a7   : > { %v3737_v8 = vsub.f32 %v7838_v24, %v3717_v57  ;;  %v4200_v58 = vshrl.u32 %v4124_v9, 16  ;;  %v4216_v50 = vshrl.u32 %v4126_v29, 16  ;;  %v4224_v61 = vshrl.u32 %v7881_v26, 16 }
 0x5a8   : > { %v3752_v16 = vmul.f32 1.442695, %v3740_v45 }
 0x5aa   : > { %v3723_v12 = vpop.xlane.xlu1 %3722 }
 0x5ab   : > { %v3739_v36 = vsub.f32 %v7842_v44, %v3723_v12 }
 0x5ae   : > { %v3729_v34 = vpop.xlane.xlu1 %3728 }
 0x5af   : > { %v3741_v57 = vsub.f32 %v7847_v55, %v3729_v34 }
 0x5b1   : > { %v3754_v44 = vmul.f32 1.442695, %v3741_v57 }
 0x5b2   : > { %v7883_v41 = vpop.xlane.xlu1 %3734 }
 0x5b3   : > { %v3743_v12 = vsub.f32 %v7852_v7, %v7883_v41 }
 0x5b5   : > { %v3758_v42 = vmul.f32 1.442695, %v3743_v12 }
 0x5b8   : > { %v4020_v14 = vpop.trf.xlu1 }
 0x5b9   : > { %v4144_v51 = vcombine.low %v7783_v0, %v4020_v14  ;;  %v4175_v0 = vrot.slane %v4161_v54, %v7333_v1  ;;  %v4208_v54 = vshrl.u32 %v4125_v22, 16  ;;  %v6979_v14 = vpop.eup %6978 }
 0x5ba   : > { %v3760_v34 = vsel %vm3711_vm5, %v6979_v14, 0.0 }
 0x5bb   : > { %v4151_v39 = vrot.slane %v4144_v51, %v7327_v59 }
 0x5bc   : > { %v4052_v63 = vpop.trf.xlu1 }
 0x5bd   : > { %v4152_v6 = vcombine.low %v3988_v31, %v4052_v63  ;;  %v3746_v31 = vmul.f32 1.442695, %v3737_v8 }
 0x5bf   : > { %v4159_v3 = vrot.slane %v4152_v6, %v7327_v59  ;;  %6980 = vpow2.f32 %v3746_v31 }
 0x5c0   : > { %6982 = vpow2.f32 %v3748_v23 }
 0x5c1   : > { %v4176_v56 = vcombine.low %v4151_v39, %v4159_v3  ;;  %v4177_v17 = vcombine.high %v4151_v39, %v4159_v3 }
 0x5c3   : > { %v4191_v32 = vrot.slane %v4177_v17, %v7333_v1  ;;  %v4184_v60 = vrot.slane %v4176_v56, %v7333_v1 }
 0x5c5   : > { %v7905_v27 = vcombine.high %v4175_v0, %v4191_v32  ;;  %v4192_v5 = vcombine.low %v4168_v40, %v4184_v60  ;;  %v4193_v43 = vcombine.high %v4168_v40, %v4184_v60  ;;  %v4194_v38 = vcombine.low %v4175_v0, %v4191_v32 }
 0x5c7   : > { %v4198_v37 = vpack.i.b16 %v4192_v5, %v4124_v9  ;;  %v4201_v62 = vshrl.u32 %v4192_v5, 16  ;;  %v4206_v30 = vpack.i.b16 %v4193_v43, %v4125_v22  ;;  %v4209_v48 = vshrl.u32 %v4193_v43, 16 }
 0x5c8   : > { %v4214_v49 = vpack.i.b16 %v4194_v38, %v4126_v29  ;;  %v4217_v13 = vshrl.u32 %v4194_v38, 16  ;;  %v4222_v52 = vpack.i.b16 %v7905_v27, %v7881_v26  ;;  %v4225_v24 = vshrl.u32 %v7905_v27, 16 }
 0x5c9   : > { %4228 = vxpose.xlu0.c.b16.start.end [1/1] (short) (narrow) %v4198_v37, 16  ;;  %v4202_v47 = vpack.i.b16 %v4201_v62, %v4200_v58  ;;  %v4210_v25 = vpack.i.b16 %v4209_v48, %v4208_v54  ;;  %v3750_v26 = vmul.f32 1.442695, %v3739_v36 }
 0x5ca   : > { %v4218_v20 = vpack.i.b16 %v4217_v13, %v4216_v50  ;;  %v4226_v18 = vpack.i.b16 %v4225_v24, %v4224_v61 }
 0x5cb   : > { %4244 = vxpose.xlu1.c.b16.start.end [1/1] (short) (narrow) %v4202_v47, 16  ;;  %6984 = vpow2.f32 %v3750_v26 }
 0x5cc   : > { %6986 = vpow2.f32 %v3752_v16  ;;  %v6981_v55 = vpop.eup %6980 }
 0x5cd   : > { %4260 = vxpose.xlu0.c.b16.start.end [1/1] (short) (narrow) %v4206_v30, 16  ;;  %6988 = vpow2.f32 %v3754_v44  ;;  %v7922_v46 = vpop.eup %6982  ;;  %v3763_v33 = vsel %vm3711_vm5, %v6981_v55, 0.0 }
 0x5ce   : > { %6990 = vpow2.f32 %v3756_v21  ;;  %v3766_v7 = vsel %vm3711_vm5, %v7922_v46, 0.0 }
 0x5cf   : > { %4276 = vxpose.xlu1.c.b16.start.end [1/1] (short) (narrow) %v4210_v25, 16  ;;  %6992 = vpow2.f32 %v3758_v42 }
 0x5d1   : > { %4292 = vxpose.xlu0.c.b16.start.end [1/1] (short) (narrow) %v4214_v49, 16 }
 0x5d3   : > { %4308 = vxpose.xlu1.c.b16.start.end [1/1] (short) (narrow) %v4218_v20, 16 }
 0x5d8   : > { %v6985_v11 = vpop.eup %6984 }
 0x5d9   : > { %v7927_v41 = vpop.eup %6986  ;;  %v3769_v51 = vsel %vm3711_vm5, %v6985_v11, 0.0 }
 0x5da   : > { %v7930_v63 = vpop.eup %6988  ;;  %v3772_v6 = vsel %vm3711_vm5, %v7927_v41, 0.0 }
 0x5db   : > { %v7934_v35 = vpop.eup %6990  ;;  %v3775_v39 = vsel %vm3711_vm5, %v7930_v63, 0.0 }
 0x5dc   : > { %v7938_v3 = vpop.eup %6992  ;;  %v3778_v28 = vsel %vm3711_vm5, %v7934_v35, 0.0 }
 0x5dd   : > { %v3781_v56 = vsel %vm3711_vm5, %v7938_v3, 0.0 }
 0x5de   : > { %3761 = vadd.xlane.f32.xlu0 %v3760_v34 }
 0x5e0   : > { %3764 = vadd.xlane.f32.xlu1 %v3763_v33 }
 0x5e2   : > { %3767 = vadd.xlane.f32.xlu0 %v3766_v7 }
 0x5e4   : > { %3770 = vadd.xlane.f32.xlu1 %v3769_v51 }
 0x5e6   : > { %3773 = vadd.xlane.f32.xlu0 %v3772_v6 }
 0x5e8   : > { %3776 = vadd.xlane.f32.xlu1 %v3775_v39 }
 0x5ea   : > { %3779 = vadd.xlane.f32.xlu0 %v3778_v28 }
 0x5ec   : > { %3782 = vadd.xlane.f32.xlu1 %v3781_v56 }
 0x617   : > { %4324 = vxpose.xlu0.c.b16.start.end [1/1] (short) (narrow) %v4222_v52, 16 }
 0x619   : > { %4340 = vxpose.xlu1.c.b16.start.end [1/1] (short) (narrow) %v4226_v18, 16 }
 0x62b   : > { %v4236_v17 = vpop.trf.xlu0 }
 0x62d   : > { %v4252_v9 = vpop.trf.xlu1 }
 0x62f   : > { %v4268_v22 = vpop.trf.xlu0 }
 0x631   : > { %v4284_v29 = vpop.trf.xlu1 }
 0x633   : > { %v4300_v0 = vpop.trf.xlu0 }
 0x634   : > { %v4356_v50 = vcombine.low %v4236_v17, %v4300_v0 }
 0x635   : > { %v4316_v32 = vpop.trf.xlu1 }
 0x636   : > { %v4381_v48 = vcombine.low %v4252_v9, %v4316_v32  ;;  %v4363_v53 = vrot.slane %v4356_v50, %v7327_v59 }
 0x638   : > { %v4388_v36 = vrot.slane %v4381_v48, %v7327_v59 }
 0x667   : > { %v3762_v40 = vpop.xlane.xlu0 %3761 }
 0x668   : > { %6994 = vrcp.f32 %v3762_v40  ;;  %v6950_v40 = vld [vmem:[%s7252_s26] sm:$0xff]  }
 0x669   : > { %v3765_v60 = vpop.xlane.xlu1 %3764 }
 0x66a   : > { %6996 = vrcp.f32 %v3765_v60 }
 0x66b   : > { %v3768_v2 = vpop.xlane.xlu0 %3767 }
 0x66c   : > { %6998 = vrcp.f32 %v3768_v2 }
 0x66d   : > { %v3771_v8 = vpop.xlane.xlu1 %3770 }
 0x66e   : > { %7000 = vrcp.f32 %v3771_v8 }
 0x66f   : > { %v3774_v27 = vpop.xlane.xlu0 %3773 }
 0x670   : > { %7002 = vrcp.f32 %v3774_v27 }
 0x671   : > { %v3777_v5 = vpop.xlane.xlu1 %3776 }
 0x672   : > { %7004 = vrcp.f32 %v3777_v5 }
 0x673   : > { %v3780_v43 = vpop.xlane.xlu0 %3779 }
 0x674   : > { %7006 = vrcp.f32 %v3780_v43  ;;  %v6951_v43 = vld [vmem:[%s7252_s26 + $0x8] sm:$0xff]  }
 0x675   : > { %v6995_v38 = vpop.eup %6994  ;;  %v3783_v58 = vpop.xlane.xlu1 %3782 }
 0x676   : > { %7008 = vrcp.f32 %v3783_v58  ;;  %v3792_v61 = vmul.f32 %v6995_v38, %v6979_v14 }
 0x677   : > { %v6997_v54 = vpop.eup %6996 }
 0x678   : > { %v3793_v37 = vmul.f32 %v6997_v54, %v6981_v55 }
 0x679   : > { %v4332_v62 = vpop.trf.xlu0  ;;  %v6999_v30 = vpop.eup %6998 }
 0x67a   : > { %v4364_v49 = vcombine.low %v4268_v22, %v4332_v62  ;;  %v3800_v13 = vpack.c.bf16 %v3793_v37, %v3792_v61  ;;  %v3794_v18 = vmul.f32 %v6999_v30, %v7922_v46  ;;  %v6952_v37 = vld [vmem:[%s7252_s26 + $0x10] sm:$0xff]   ;;  %v6953_v30 = vld [vmem:[%s7252_s26 + $0x18] sm:$0xff]  }
 0x67b   : > { %v7001_v52 = vpop.eup %7000  ;;  %v4348_v24 = vpop.trf.xlu1 }
 0x67c   : > { %v4371_v19 = vrot.slane %v4364_v49, %v7327_v59  ;;  %v4389_v47 = vcombine.low %v4284_v29, %v4348_v24  ;;  %v4422_v25 = vsel %vm3711_vm5, %v3800_v13, 0  ;;  %v3795_v31 = vmul.f32 %v7001_v52, %v6985_v11  ;;  %v6954_v49 = vld [vmem:[%s7252_s26 + $0x20] sm:$0xff]   ;;  %v6955_v52 = vld [vmem:[%s7252_s26 + $0x28] sm:$0xff]  }
 0x67d   : > { %v7003_v20 = vpop.eup %7002  ;;  %6716 = vmatpush3.bf16.xpose.msra.mxu1 %v4422_v25  ;;  %v4868_v0 = vshrl.u32 %v3800_v13, 16 }
 0x67e   : > { %v4372_v23 = vcombine.low %v4363_v53, %v4371_v19  ;;  %v4396_v45 = vrot.slane %v4389_v47, %v7327_v59  ;;  %6727 = vmatprep.subr.bf16.mxu1 %v7078_v15  ;;  %v3801_v57 = vpack.c.bf16 %v3795_v31, %v3794_v18  ;;  %v3796_v44 = vmul.f32 %v7003_v20, %v7927_v41  ;;  %v6956_v47 = vld [vmem:[%s7252_s26 + $0x30] sm:$0xff]   ;;  %v6957_v18 = vld [vmem:[%s7252_s26 + $0x38] sm:$0xff]  }
 0x67f   : > { %v7005_v26 = vpop.eup %7004  ;;  %v4879_v20 = vpack.i.b16 %v7087_v10, %v7087_v10 }
 0x680   : > { %v4379_v16 = vrot.slane %v4372_v23, %v7333_v1  ;;  %v4397_v4 = vcombine.low %v4388_v36, %v4396_v45  ;;  %v3797_v12 = vmul.f32 %v7005_v26, %v7930_v63  ;;  %v4468_v21 = vsel %vm3711_vm5, %v3801_v57, 0  ;;  %v6958_v26 = vld [vmem:[%s7252_s26 + $0x40] sm:$0xff]  }
 0x681   : > { %v7007_v42 = vpop.eup %7006  ;;  %6722 = vmatpush3.bf16.xpose.msra.mxu0 %v4468_v21  ;;  %v4869_v56 = vshrl.u32 %v3801_v57, 16  ;;  %v7970_v22 = vpack.i.b16 %v3801_v57, %v3800_v13 }
 0x682   : > { %v4404_v14 = vrot.slane %v4397_v4, %v7333_v1  ;;  %v3802_v55 = vpack.c.bf16 %v3797_v12, %v3796_v44  ;;  %6733 = vmatprep.subr.bf16.mxu0 %v7078_v15  ;;  %v4409_v46 = vshrl.u32 %v4379_v16, 16  ;;  %v3798_v51 = vmul.f32 %v7007_v42, %v7934_v35  ;;  %v6959_v44 = vld [vmem:[%s7252_s26 + $0x48] sm:$0xff]  }
 0x683   : > { %v7009_v34 = vpop.eup %7008  ;;  %v4380_v28 = vcombine.high %v4379_v16, %v7087_v10  ;;  %v7980_v27 = vpack.i.b16 %v4869_v56, %v4868_v0  ;;  %v4891_v5 = vrot.slane %v7970_v22, %v7327_v59  ;;  %v4884_v23 = vcombine.high %v7970_v22, %v4879_v20  ;;  %v6964_v56 = vld [vmem:[%s7252_s26 + $0x70] sm:$0xff]  }
 0x684   : > { %v4408_v33 = vpack.i.b16 %v4404_v14, %v4379_v16  ;;  %v4410_v11 = vshrl.u32 %v4404_v14, 16  ;;  %v4514_v7 = vsel %vm3711_vm5, %v3802_v55, 0  ;;  %v3799_v41 = vmul.f32 %v7009_v34, %v7938_v3 }
 0x685   : > { %v4405_v6 = vcombine.high %v4404_v14, %v7087_v10  ;;  %v4874_v17 = vshrl.u32 %v3802_v55, 16  ;;  %v4415_v8 = vshrl.u32 %v4380_v28, 16  ;;  %v4957_v50 = vrot.slane %v7980_v27, %v7327_v59 }
 0x686   : > { %6718 = vmatmul.mubr.msk.bf16.vlgmr.msra.gmra.mxu1 %vm3711_vm5, %v4408_v33  ;;  %v4411_v63 = vpack.i.b16 %v4410_v11, %v4409_v46  ;;  %v3803_v39 = vpack.c.bf16 %v3799_v41, %v3798_v51  ;;  %v4950_v4 = vcombine.high %v7980_v27, %v4879_v20  ;;  %v4898_v12 = vrot.slane %v4884_v23, %v7327_v59  ;;  %v6960_v46 = vld [vmem:[%s7252_s26 + $0x50] sm:$0xff]   ;;  %v6961_v11 = vld [vmem:[%s7252_s26 + $0x58] sm:$0xff]   ;;  %v6962_v51 = vld [vmem:[%s7252_s26 + $0x60] sm:$0xff]  }
 0x687   : > { %6728 = vmatpush3.bf16.xpose.msra.mxu1 %v4514_v7  ;;  %6729 = vmatprep.mubr.msk.bf16.mxu1 %vm7079_vm1, %v7078_v15  ;;  %v4416_v29 = vshrl.u32 %v4405_v6, 16  ;;  %v4414_v2 = vpack.i.b16 %v4405_v6, %v4380_v28 }
 0x688   : > { %6739 = vmatprep.subr.bf16.mxu1 %v7078_v15  ;;  %6724 = vmatmul.mubr.msk.bf16.vlgmr.msra.gmra.mxu0 %vm3711_vm5, %v4411_v63  ;;  %v4560_v35 = vsel %vm3711_vm5, %v3803_v39, 0  ;;  %v7968_v3 = vpack.i.b16 %v3803_v39, %v3802_v55  ;;  %v4875_v9 = vshrl.u32 %v3803_v39, 16  ;;  %v4964_v55 = vrot.slane %v4950_v4, %v7327_v59  ;;  %v6963_v63 = vld [vmem:[%s7252_s26 + $0x68] sm:$0xff]  }
 0x689   : > { %6734 = vmatpush3.bf16.xpose.msra.mxu0 %v4560_v35  ;;  %6735 = vmatprep.mubr.msk.bf16.mxu0 %vm7079_vm1, %v7078_v15  ;;  %v4417_v38 = vpack.i.b16 %v4416_v29, %v4415_v8  ;;  %v6965_v35 = vld [vmem:[%s7252_s26 + $0x78] sm:$0xff]   ;;  %s8265_s26 = scalar_lea.hbm %s8325_s16, %s6492_s21 }
 0x68a   : > { %v7974_v32 = vpack.i.b16 %v4875_v9, %v4874_v17  ;;  %6745 = vmatprep.subr.bf16.mxu0 %v7078_v15  ;;  %v4906_v60 = vrot.slane %v7968_v3, %v7327_v59  ;;  %v4899_v36 = vcombine.high %v7968_v3, %v4879_v20 }
 0x68c   : > { %v4972_v58 = vrot.slane %v7974_v32, %v7327_v59  ;;  %v4914_v54 = vcombine.low %v4891_v5, %v4906_v60  ;;  %v4915_v53 = vcombine.high %v4891_v5, %v4906_v60  ;;  %v4965_v45 = vcombine.high %v7974_v32, %v4879_v20 }
 0x68d   : > { %v4913_v16 = vrot.slane %v4899_v36, %v7327_v59 }
 0x68e   : > { %6730 = vmatmul.mubr.msk.bf16.vlgmr.msra.gmra.mxu1 %vm3711_vm5, %v4414_v2  ;;  %v4980_v61 = vcombine.low %v4957_v50, %v4972_v58  ;;  %v4922_v62 = vrot.slane %v4914_v54, %v7333_v1  ;;  %v4981_v19 = vcombine.high %v4957_v50, %v4972_v58  ;;  %v4929_v25 = vrot.slane %v4915_v53, %v7333_v1 }
 0x68f   : > { %6740 = vmatpush3.bf16.msra.mxu1 %v6950_v40  ;;  %6741 = vmatprep.mubr.msk.bf16.mxu1 %vm7079_vm1, %v7078_v15  ;;  %v4979_v42 = vrot.slane %v4965_v45, %v7327_v59  ;;  %v4930_v14 = vcombine.low %v4898_v12, %v4913_v16  ;;  %v4931_v39 = vcombine.high %v4898_v12, %v4913_v16 }
 0x690   : > { %6751 = vmatprep.subr.bf16.mxu1 %v7078_v15  ;;  %6736 = vmatmul.mubr.msk.bf16.vlgmr.msra.gmra.mxu0 %vm3711_vm5, %v4417_v38  ;;  %v4988_v48 = vrot.slane %v4980_v61, %v7333_v1  ;;  %v4946_v13 = vcombine.high %v4922_v62, %v7087_v10  ;;  %v4995_v31 = vrot.slane %v4981_v19, %v7333_v1 }
 0x691   : > { %6746 = vmatpush3.bf16.msra.mxu0 %v6951_v43  ;;  %6747 = vmatprep.mubr.msk.bf16.mxu0 %vm7079_vm1, %v7078_v15  ;;  %v4947_v57 = vcombine.high %v4929_v25, %v7087_v10  ;;  %v4996_v34 = vcombine.low %v4964_v55, %v4979_v42  ;;  %v4938_v33 = vrot.slane %v4930_v14, %v7333_v1 }
 0x692   : > { %6757 = vmatprep.subr.bf16.mxu0 %v7078_v15  ;;  %v5012_v24 = vcombine.high %v4988_v48, %v7087_v10  ;;  %v5013_v21 = vcombine.high %v4995_v31, %v7087_v10  ;;  %v4997_v28 = vcombine.high %v4964_v55, %v4979_v42  ;;  %v4945_v17 = vrot.slane %v4931_v39, %v7333_v1 }
 0x693   : > { %v5004_v7 = vrot.slane %v4996_v34, %v7333_v1  ;;  %v4948_v41 = vcombine.high %v4938_v33, %v7087_v10 }
 0x694   : > { %v5011_v3 = vrot.slane %v4997_v28, %v7333_v1  ;;  %v4949_v9 = vcombine.high %v4945_v17, %v7087_v10 }
 0x695   : > { %v5014_v6 = vcombine.high %v5004_v7, %v7087_v10 }
 0x696   : > { %6742 = vmatmul.mubr.msk.bf16.vlgmr.msra.gmra.mxu1 %vm3711_vm5, %v4922_v62  ;;  %v5015_v22 = vcombine.high %v5011_v3, %v7087_v10 }
 0x697   : > { %6752 = vmatpush3.bf16.msra.mxu1 %v6952_v37  ;;  %6753 = vmatprep.mubr.msk.bf16.mxu1 %vm7079_vm1, %v7078_v15 }
 0x698   : > { %6763 = vmatprep.subr.bf16.mxu1 %v7078_v15  ;;  %6748 = vmatmul.mubr.msk.bf16.vlgmr.msra.gmra.mxu0 %vm3711_vm5, %v4988_v48 }
 0x699   : > { %6758 = vmatpush3.bf16.msra.mxu0 %v6953_v30  ;;  %6759 = vmatprep.mubr.msk.bf16.mxu0 %vm7079_vm1, %v7078_v15 }
 0x69a   : > { %6769 = vmatprep.subr.bf16.mxu0 %v7078_v15 }
 0x69e   : > { %6754 = vmatmul.mubr.msk.bf16.vlgmr.msra.gmra.mxu1 %vm3711_vm5, %v4946_v13 }
 0x69f   : > { %6764 = vmatpush3.bf16.msra.mxu1 %v6954_v49  ;;  %6765 = vmatprep.mubr.msk.bf16.mxu1 %vm7079_vm1, %v7078_v15 }
 0x6a0   : > { %6775 = vmatprep.subr.bf16.mxu1 %v7078_v15  ;;  %6760 = vmatmul.mubr.msk.bf16.vlgmr.msra.gmra.mxu0 %vm3711_vm5, %v5012_v24 }
 0x6a1   : > { %6770 = vmatpush3.bf16.msra.mxu0 %v6955_v52  ;;  %6771 = vmatprep.mubr.msk.bf16.mxu0 %vm7079_vm1, %v7078_v15 }
 0x6a2   : > { %6781 = vmatprep.subr.bf16.mxu0 %v7078_v15 }
 0x6a6   : > { %6766 = vmatmul.mubr.msk.bf16.vlgmr.msra.gmra.mxu1 %vm3711_vm5, %v4929_v25 }
 0x6a7   : > { %6776 = vmatpush3.bf16.msra.mxu1 %v6956_v47  ;;  %6777 = vmatprep.mubr.msk.bf16.mxu1 %vm7079_vm1, %v7078_v15 }
 0x6a8   : > { %6787 = vmatprep.subr.bf16.mxu1 %v7078_v15  ;;  %6772 = vmatmul.mubr.msk.bf16.vlgmr.msra.gmra.mxu0 %vm3711_vm5, %v4995_v31 }
 0x6a9   : > { %6782 = vmatpush3.bf16.msra.mxu0 %v6957_v18  ;;  %6783 = vmatprep.mubr.msk.bf16.mxu0 %vm7079_vm1, %v7078_v15 }
 0x6aa   : > { %6793 = vmatprep.subr.bf16.mxu0 %v7078_v15 }
 0x6ae   : > { %6778 = vmatmul.mubr.msk.bf16.vlgmr.msra.gmra.mxu1 %vm3711_vm5, %v4947_v57 }
 0x6af   : > { %6788 = vmatpush3.bf16.msra.mxu1 %v6958_v26  ;;  %6789 = vmatprep.mubr.msk.bf16.mxu1 %vm7079_vm1, %v7078_v15 }
 0x6b0   : > { %6799 = vmatprep.subr.bf16.mxu1 %v7078_v15  ;;  %6784 = vmatmul.mubr.msk.bf16.vlgmr.msra.gmra.mxu0 %vm3711_vm5, %v5013_v21 }
 0x6b1   : > { %6794 = vmatpush3.bf16.msra.mxu0 %v6959_v44  ;;  %6795 = vmatprep.mubr.msk.bf16.mxu0 %vm7079_vm1, %v7078_v15 }
 0x6b2   : > { %6805 = vmatprep.subr.bf16.mxu0 %v7078_v15 }
 0x6b6   : > { %6790 = vmatmul.mubr.msk.bf16.vlgmr.msra.gmra.mxu1 %vm3711_vm5, %v4938_v33 }
 0x6b7   : > { %6800 = vmatpush3.bf16.msra.mxu1 %v6960_v46  ;;  %6801 = vmatprep.mubr.msk.bf16.mxu1 %vm7079_vm1, %v7078_v15 }
 0x6b8   : > { %6811 = vmatprep.subr.bf16.mxu1 %v7078_v15  ;;  %6796 = vmatmul.mubr.msk.bf16.vlgmr.msra.gmra.mxu0 %vm3711_vm5, %v5004_v7 }
 0x6b9   : > { %6806 = vmatpush3.bf16.msra.mxu0 %v6961_v11  ;;  %6807 = vmatprep.mubr.msk.bf16.mxu0 %vm7079_vm1, %v7078_v15 }
 0x6ba   : > { %6817 = vmatprep.subr.bf16.mxu0 %v7078_v15 }
 0x6be   : > { %6802 = vmatmul.mubr.msk.bf16.vlgmr.msra.gmra.mxu1 %vm3711_vm5, %v4948_v41 }
 0x6bf   : > { %6812 = vmatpush3.bf16.msra.mxu1 %v6962_v51  ;;  %6813 = vmatprep.mubr.msk.bf16.mxu1 %vm7079_vm1, %v7078_v15 }
 0x6c0   : > { %6823 = vmatprep.subr.bf16.mxu1 %v7078_v15  ;;  %6808 = vmatmul.mubr.msk.bf16.vlgmr.msra.gmra.mxu0 %vm3711_vm5, %v5014_v6 }
 0x6c1   : > { %6818 = vmatpush3.bf16.msra.mxu0 %v6963_v63  ;;  %6819 = vmatprep.mubr.msk.bf16.mxu0 %vm7079_vm1, %v7078_v15 }
 0x6c2   : > { %6829 = vmatprep.subr.bf16.mxu0 %v7078_v15 }
 0x6c6   : > { %6814 = vmatmul.mubr.msk.bf16.vlgmr.msra.gmra.mxu1 %vm3711_vm5, %v4945_v17 }
 0x6c7   : > { %6824 = vmatpush3.bf16.msra.mxu1 %v6964_v56  ;;  %6825 = vmatprep.mubr.msk.bf16.mxu1 %vm7079_vm1, %v7078_v15 }
 0x6c8   : > { %6835 = vmatprep.subr.bf16.mxu1 %v7078_v15  ;;  %6820 = vmatmul.mubr.msk.bf16.vlgmr.msra.gmra.mxu0 %vm3711_vm5, %v5011_v3 }
 0x6c9   : > { %6830 = vmatpush3.bf16.msra.mxu0 %v6965_v35  ;;  %6831 = vmatprep.mubr.msk.bf16.mxu0 %vm7079_vm1, %v7078_v15 }
 0x6ca   : > { %6843 = vmatprep.subr.bf16.mxu0 %v7078_v15 }
 0x6ce   : > { %6826 = vmatmul.mubr.msk.bf16.vlgmr.msra.gmra.mxu1 %vm3711_vm5, %v4949_v9 }
 0x6cf   : > { %6839 = vmatprep.mubr.msk.bf16.mxu1 %vm7079_vm1, %v7078_v15 }
 0x6d0   : > { %6832 = vmatmul.mubr.msk.bf16.vlgmr.msra.gmra.mxu0 %vm3711_vm5, %v5015_v22 }
 0x6d1   : > { %6847 = vmatprep.mubr.msk.bf16.mxu0 %vm7079_vm1, %v7078_v15 }
 0x746   : > { %v4458_v29 = vpop.f32.mrf.mxu1 }
 0x747   : > { %4602 = vxpose.xlu0.b32.start.end [1/1] (short) (narrow) %v4458_v29, 16 }
 0x748   : > { %v6719_v0 = vpop.f32.mrf.mxu1  ;;  %v4504_v32 = vpop.f32.mrf.mxu0 }
 0x749   : > { %4634 = vxpose.xlu1.b32.start.end [1/1] (short) (narrow) %v4504_v32, 16 }
 0x74a   : > { %v4461_v40 = vpop.f32.mrf.mxu1  ;;  %v6725_v60 = vpop.f32.mrf.mxu0 }
 0x74c   : > { %v6720_v2 = vpop.f32.mrf.mxu1  ;;  %v4507_v8 = vpop.f32.mrf.mxu0 }
 0x74e   : > { %v4550_v27 = vpop.f32.mrf.mxu1  ;;  %v6726_v5 = vpop.f32.mrf.mxu0 }
 0x74f   : > { %4666 = vxpose.xlu0.b32.start.end [1/1] (short) (narrow) %v4550_v27, 16 }
 0x750   : > { %v6731_v10 = vpop.f32.mrf.mxu1  ;;  %v4596_v43 = vpop.f32.mrf.mxu0 }
 0x752   : > { %v4553_v38 = vpop.f32.mrf.mxu1  ;;  %v6737_v58 = vpop.f32.mrf.mxu0 }
 0x754   : > { %v6732_v54 = vpop.f32.mrf.mxu1  ;;  %4698 = vxpose.xlu0.b32.start.end [1/1] (short) (narrow) %v4596_v43, 16  ;;  %v4599_v50 = vpop.f32.mrf.mxu0 }
 0x756   : > { %v8099_v61 = vpop.f32.mrf.mxu1  ;;  %v6738_v37 = vpop.f32.mrf.mxu0 }
 0x758   : > { %v6743_v62 = vpop.f32.mrf.mxu1  ;;  %v8101_v30 = vpop.f32.mrf.mxu0 }
 0x75a   : > { %v5062_v48 = vpop.f32.mrf.mxu1  ;;  %v6749_v49 = vpop.f32.mrf.mxu0 }
 0x75c   : > { %v6744_v13 = vpop.f32.mrf.mxu1  ;;  %v5111_v52 = vpop.f32.mrf.mxu0 }
 0x75e   : > { %v8103_v24 = vpop.f32.mrf.mxu1  ;;  %v6750_v53 = vpop.f32.mrf.mxu0 }
 0x760   : > { %v6755_v19 = vpop.f32.mrf.mxu1  ;;  %v8105_v47 = vpop.f32.mrf.mxu0 }
 0x762   : > { %v5160_v25 = vpop.f32.mrf.mxu1  ;;  %v6761_v20 = vpop.f32.mrf.mxu0 }
 0x764   : > { %v6756_v18 = vpop.f32.mrf.mxu1  ;;  %v5209_v31 = vpop.f32.mrf.mxu0 }
 0x766   : > { %v8107_v36 = vpop.f32.mrf.mxu1  ;;  %v6762_v23 = vpop.f32.mrf.mxu0 }
 0x768   : > { %v6767_v45 = vpop.f32.mrf.mxu1  ;;  %v8109_v26 = vpop.f32.mrf.mxu0 }
 0x76a   : > { %v5258_v57 = vpop.f32.mrf.mxu1  ;;  %v6773_v16 = vpop.f32.mrf.mxu0 }
 0x76c   : > { %v6768_v4 = vpop.f32.mrf.mxu1  ;;  %v5307_v44 = vpop.f32.mrf.mxu0 }
 0x76e   : > { %v8111_v12 = vpop.f32.mrf.mxu1  ;;  %v6774_v21 = vpop.f32.mrf.mxu0 }
 0x770   : > { %v6779_v42 = vpop.f32.mrf.mxu1  ;;  %v8113_v14 = vpop.f32.mrf.mxu0 }
 0x772   : > { %v5356_v55 = vpop.f32.mrf.mxu1  ;;  %v6785_v34 = vpop.f32.mrf.mxu0 }
 0x774   : > { %v6780_v46 = vpop.f32.mrf.mxu1  ;;  %v5405_v33 = vpop.f32.mrf.mxu0 }
 0x776   : > { %v8115_v11 = vpop.f32.mrf.mxu1  ;;  %v6786_v7 = vpop.f32.mrf.mxu0 }
 0x778   : > { %v6791_v51 = vpop.f32.mrf.mxu1  ;;  %v8117_v41 = vpop.f32.mrf.mxu0 }
 0x77a   : > { %v5454_v63 = vpop.f32.mrf.mxu1  ;;  %v6797_v6 = vpop.f32.mrf.mxu0 }
 0x77c   : > { %v6792_v39 = vpop.f32.mrf.mxu1  ;;  %v5503_v28 = vpop.f32.mrf.mxu0 }
 0x77e   : > { %v8119_v56 = vpop.f32.mrf.mxu1  ;;  %v6798_v17 = vpop.f32.mrf.mxu0 }
 0x780   : > { %v6803_v35 = vpop.f32.mrf.mxu1  ;;  %v8121_v3 = vpop.f32.mrf.mxu0 }
 0x782   : > { %v5552_v9 = vpop.f32.mrf.mxu1  ;;  %v6809_v22 = vpop.f32.mrf.mxu0 }
 0x784   : > { %v6804_v29 = vpop.f32.mrf.mxu1  ;;  %v5601_v0 = vpop.f32.mrf.mxu0 }
 0x786   : > { %v8123_v32 = vpop.f32.mrf.mxu1  ;;  %v6810_v40 = vpop.f32.mrf.mxu0 }
 0x788   : > { %v6815_v60 = vpop.f32.mrf.mxu1  ;;  %v8125_v2 = vpop.f32.mrf.mxu0 }
 0x78a   : > { %v5650_v8 = vpop.f32.mrf.mxu1  ;;  %v6821_v27 = vpop.f32.mrf.mxu0 }
 0x78c   : > { %v6816_v5 = vpop.f32.mrf.mxu1  ;;  %v5699_v10 = vpop.f32.mrf.mxu0 }
 0x78e   : > { %v8127_v43 = vpop.f32.mrf.mxu1  ;;  %v6822_v38 = vpop.f32.mrf.mxu0 }
 0x790   : > { %v6827_v58 = vpop.f32.mrf.mxu1  ;;  %v8129_v54 = vpop.f32.mrf.mxu0 }
 0x792   : > { %v5748_v50 = vpop.f32.mrf.mxu1  ;;  %v6833_v37 = vpop.f32.mrf.mxu0 }
 0x794   : > { %v6828_v62 = vpop.f32.mrf.mxu1  ;;  %v5797_v48 = vpop.f32.mrf.mxu0 }
 0x796   : > { %v6834_v49 = vpop.f32.mrf.mxu0 }
 0x7c3   : > { %v4618_v13 = vpop.trf.xlu0 }
 0x7c5   : > { %v4650_v25 = vpop.trf.xlu1 }
 0x7c7   : > { %v4619_v52 = vpop.trf.xlu0 }
 0x7c9   : > { %v4651_v21 = vpop.trf.xlu1 }
 0x7cb   : > { %v4682_v53 = vpop.trf.xlu0 }
 0x7cc   : > { %v4730_v20 = vcombine.low %v4618_v13, %v4682_v53  ;;  %v4731_v18 = vcombine.high %v4618_v13, %v4682_v53 }
 0x7ce   : > { %v4738_v57 = vrot.slane %v4730_v20, %v7327_v59  ;;  %v4745_v16 = vrot.slane %v4731_v18, %v7327_v59 }
 0x7cf   : > { %v4683_v19 = vpop.trf.xlu0 }
 0x7d0   : > { %v4798_v42 = vcombine.low %v4619_v52, %v4683_v19  ;;  %v4799_v55 = vcombine.high %v4619_v52, %v4683_v19 }
 0x7d2   : > { %v4806_v9 = vrot.slane %v4798_v42, %v7327_v59  ;;  %v4813_v22 = vrot.slane %v4799_v55, %v7327_v59 }
 0x7d3   : > { %v4714_v31 = vpop.trf.xlu0 }
 0x7d4   : > { %v4746_v23 = vcombine.low %v4650_v25, %v4714_v31  ;;  %v4747_v45 = vcombine.high %v4650_v25, %v4714_v31 }
 0x7d6   : > { %v4754_v4 = vrot.slane %v4746_v23, %v7327_v59  ;;  %v4761_v44 = vrot.slane %v4747_v45, %v7327_v59 }
 0x7d7   : > { %v4715_v34 = vpop.trf.xlu0 }
 0x7d8   : > { %v4762_v46 = vcombine.low %v4738_v57, %v4754_v4  ;;  %v4763_v33 = vcombine.high %v4738_v57, %v4754_v4  ;;  %v4778_v7 = vcombine.low %v4745_v16, %v4761_v44  ;;  %v4779_v51 = vcombine.high %v4745_v16, %v4761_v44 }
 0x7d9   : > { %v4814_v63 = vcombine.low %v4651_v21, %v4715_v34  ;;  %v4815_v6 = vcombine.high %v4651_v21, %v4715_v34 }
 0x7da   : > { %v4770_v39 = vrot.slane %v4762_v46, %v7333_v1  ;;  %v4777_v28 = vrot.slane %v4763_v33, %v7333_v1  ;;  %v4786_v17 = vrot.slane %v4778_v7, %v7333_v1  ;;  %v4793_v35 = vrot.slane %v4779_v51, %v7333_v1 }
 0x7db   : > { %v4822_v29 = vrot.slane %v4814_v63, %v7327_v59  ;;  %v4829_v0 = vrot.slane %v4815_v6, %v7327_v59 }
 0x7dc   : > { %v4794_v40 = vcombine.high %v4770_v39, %v7078_v15  ;;  %v4795_v60 = vcombine.high %v4777_v28, %v7078_v15  ;;  %v4796_v8 = vcombine.high %v4786_v17, %v7078_v15  ;;  %v4797_v27 = vcombine.high %v4793_v35, %v7078_v15 }
 0x7dd   : > { %v5800_v5 = vadd.f32 %v8099_v61, %v4770_v39  ;;  %v5802_v10 = vadd.f32 %v8103_v24, %v4777_v28  ;;  %v5804_v38 = vadd.f32 %v8107_v36, %v4786_v17  ;;  %v5806_v58 = vadd.f32 %v8111_v12, %v4793_v35 }
 0x7de   : > { %v5801_v50 = vadd.f32 %v8101_v30, %v4794_v40  ;;  %v5803_v37 = vadd.f32 %v8105_v47, %v4795_v60  ;;  %v5805_v62 = vadd.f32 %v8109_v26, %v4796_v8  ;;  %v5807_v48 = vadd.f32 %v8113_v14, %v4797_v27 }
 0x7df   : > { %v5816_v49 = vcombine.low %v5800_v5, %v5802_v10  ;;  %v4830_v13 = vcombine.low %v4806_v9, %v4822_v29  ;;  %v4831_v52 = vcombine.high %v4806_v9, %v4822_v29  ;;  %v4846_v61 = vcombine.low %v4813_v22, %v4829_v0  ;;  %v6967_v5 = vld [vmem:[%s8317_s8] sm:$0xff]  }
 0x7e0   : > { %v5824_v53 = vcombine.low %v5801_v50, %v5803_v37  ;;  %v5840_v19 = vcombine.low %v5805_v62, %v5807_v48  ;;  %v4847_v25 = vcombine.high %v4813_v22, %v4829_v0  ;;  %v5832_v36 = vcombine.low %v5804_v38, %v5806_v58 }
 0x7e1   : > { %v5823_v24 = vrot.slane %v5816_v49, %v7327_v59  ;;  %v4838_v12 = vrot.slane %v4830_v13, %v7333_v1  ;;  %v4845_v30 = vrot.slane %v4831_v52, %v7333_v1  ;;  %v4854_v47 = vrot.slane %v4846_v61, %v7333_v1 }
 0x7e2   : > { %v4861_v26 = vrot.slane %v4847_v25, %v7333_v1  ;;  %v5831_v14 = vrot.slane %v5824_v53, %v7327_v59  ;;  %v5847_v20 = vrot.slane %v5840_v19, %v7327_v59  ;;  %v5839_v21 = vrot.slane %v5832_v36, %v7327_v59 }
 0x7e3   : > { %v4862_v18 = vcombine.high %v4838_v12, %v7078_v15  ;;  %v4863_v31 = vcombine.high %v4845_v30, %v7078_v15  ;;  %v5808_v23 = vadd.f32 %v8115_v11, %v4838_v12  ;;  %v5810_v45 = vadd.f32 %v8119_v56, %v4845_v30 }
 0x7e4   : > { %v4864_v57 = vcombine.high %v4854_v47, %v7078_v15  ;;  %v4865_v16 = vcombine.high %v4861_v26, %v7078_v15  ;;  %v5812_v4 = vadd.f32 %v8123_v32, %v4854_v47  ;;  %v5814_v44 = vadd.f32 %v8127_v43, %v4861_v26 }
 0x7e5   : > { %v5809_v42 = vadd.f32 %v8117_v41, %v4862_v18  ;;  %v5811_v55 = vadd.f32 %v8121_v3, %v4863_v31  ;;  %v5884_v34 = vcombine.low %v5808_v23, %v5810_v45  ;;  %v5849_v7 = vcombine.high %v5823_v24, %v5831_v14  ;;  %v6966_v3 = vld [vmem:[%s8317_s8 + $0x8] sm:$0xff]   ;;  %v6467_v45 = vld [vmem:[%s8318_s9] ss:$0 sm:$0xff] }
 0x7e6   : > { %v5813_v46 = vadd.f32 %v8125_v2, %v4864_v57  ;;  %v5815_v11 = vadd.f32 %v8129_v54, %v4865_v16  ;;  %v5900_v56 = vcombine.low %v5812_v4, %v5814_v44  ;;  %v5865_v51 = vcombine.high %v5839_v21, %v5847_v20  ;;  %6836 = vmatpush3.bf16.msra.mxu1 %v6966_v3  ;;  %v7014_v44 = vld [vmem:[%s7238_s30] sm:$0xff] }
 0x7e7   : > { %v5892_v33 = vcombine.low %v5809_v42, %v5811_v55  ;;  %v5848_v63 = vcombine.low %v5823_v24, %v5831_v14  ;;  %v5864_v32 = vcombine.low %v5839_v21, %v5847_v20  ;;  %v5891_v43 = vrot.slane %v5884_v34, %v7327_v59  ;;  %6837 = vmatprep.subr.bf16.mxu1 %v7078_v15 }
 0x7e8   : > { %v5908_v6 = vcombine.low %v5813_v46, %v5815_v11  ;;  %v5907_v2 = vrot.slane %v5900_v56, %v7327_v59  ;;  %v5863_v17 = vrot.slane %v5849_v7, %v7333_v1  ;;  %v5879_v35 = vrot.slane %v5865_v51, %v7333_v1  ;;  %v7015_v11 = vld [vmem:[%s7238_s30 + $0x8] sm:$0xff] }
 0x7e9   : > { %v5899_v39 = vrot.slane %v5892_v33, %v7327_v59  ;;  %v5856_v41 = vrot.slane %v5848_v63, %v7333_v1  ;;  %v5872_v28 = vrot.slane %v5864_v32, %v7333_v1 }
 0x7ea   : > { %v5915_v54 = vrot.slane %v5908_v6, %v7327_v59  ;;  %v5882_v10 = vcombine.low %v5863_v17, %v5879_v35  ;;  %6838 = vmatpush3.bf16.msra.mxu1 %v6967_v5 }
 0x7eb   : > { %v5917_v9 = vcombine.high %v5891_v43, %v5899_v39  ;;  %v5916_v22 = vcombine.low %v5891_v43, %v5899_v39  ;;  %v5880_v40 = vcombine.low %v5856_v41, %v5872_v28  ;;  %v5881_v58 = vcombine.high %v5856_v41, %v5872_v28  ;;  %6851 = vmatprep.subr.bf16.mxu1 %v7078_v15  ;;  %v6969_v28 = vld [vmem:[%s8321_s12] sm:$0xff]  }
 0x7ec   : > { %v5933_v29 = vcombine.high %v5907_v2, %v5915_v54  ;;  %v5932_v0 = vcombine.low %v5907_v2, %v5915_v54  ;;  %v6968_v54 = vld [vmem:[%s8321_s12 + $0x8] sm:$0xff]  }
 0x7ed   : > { %v5931_v60 = vrot.slane %v5917_v9, %v7333_v1  ;;  %v5924_v8 = vrot.slane %v5916_v22, %v7333_v1  ;;  %6844 = vmatpush3.bf16.msra.mxu0 %v6968_v54 }
 0x7ee   : > { %v5947_v59 = vrot.slane %v5933_v29, %v7333_v1  ;;  %v5940_v27 = vrot.slane %v5932_v0, %v7333_v1  ;;  %v5883_v1 = vcombine.high %v5863_v17, %v5879_v35  ;;  %6845 = vmatprep.subr.bf16.mxu0 %v7078_v15  ;;  %v6970_v17 = vld [vmem:[%s8323_s14 + $0x18] sm:$0xff]  }
 0x7f0   : > { %v5950_v38 = vcombine.low %v5931_v60, %v5947_v59  ;;  %v5949_v50 = vcombine.high %v5924_v8, %v5940_v27  ;;  %v5948_v37 = vcombine.low %v5924_v8, %v5940_v27  ;;  %v5951_v49 = vcombine.high %v5931_v60, %v5947_v59  ;;  %v6471_v59 = vld [vmem:[%s8319_s10] ss:$0 sm:$0xff] }
 0x7f1   : > { %6846 = vmatpush3.bf16.msra.mxu0 %v6969_v28 }
 0x7f2   : > { %v6922_v62 = vpack.i.bf16 %v5950_v38, %v5882_v10  ;;  %v6917_v48 = vpack.i.bf16 %v5949_v50, %v5881_v58  ;;  %v6927_v13 = vpack.i.bf16 %v5951_v49, %v5883_v1  ;;  %v6472_v38 = vld [vmem:[%s8320_s11] ss:$0 sm:$0xff]  ;;  %v6972_v49 = vld [vmem:[%s8323_s14 + $0x8] sm:$0xff]  }
 0x7f3   : > { %v6973_v1 = vld [vmem:[%s8323_s14] sm:$0xff]  }
 0x7f4   : > { %6923 = vrot.lane.b32.xlu0 %v6922_v62, %s7089_s20  ;;  %6918 = vrot.lane.b32.xlu1 %v6917_v48, %s7090_s28  ;;  %v6971_v48 = vld [vmem:[%s8323_s14 + $0x10] sm:$0xff]   ;;  %s557_s20 = sand.u32 1, %s7068_s22  }
 0x7f5   : > { %s6372_s23 = sshll.u32 %s557_s20, 4  ;;  %s8268_s24 = scalar_lea.sflag [#allocation3], %s557_s20 }
 0x7f6   : > { %s559_s30 = scalar_lea.vmem [#allocation2], %s6372_s23 }
 0x7f7   : > { %s6270_s27 = sshll.u32 %s559_s30, 4  ;;  %s8259_s27 = int_to_ptr.vmem [resolvable:$true] %s6270_s27 }
 0x7f8   : > { %6928 = vrot.lane.b32.xlu1 %v6927_v13, %s7091_s29  ;;  %v6473_v13 = vld [vmem:[%s8322_s13] ss:$0 sm:$0xff]  ;;  %s7016_s25 = scalar_lea.vmem %s8259_s27, 256  ;;  %s7092_s29 = smov [#allocation2]  }
 0x7f9   : > { %p7017_p11 = scmp.ne.s32.totalorder %s8259_s27, %s7016_s25  ;;  %s7020_s17 = sshll.u32 %s7092_s29, 4  ;;  %s7021_s17 = int_to_ptr.vmem [resolvable:$false] %s7020_s17 }
 0x7fa   : > { %s7022_s23 = scalar_lea.vmem %s7021_s17, 512  ;;  %p7023_p0 = scmp.lt.s32.totalorder %s8259_s27, %s7021_s17 }
 0x7fb   : > { %p7018_p12 = pnand %p7017_p11, %p7217_p5  ;;  %p7024_p1 = scmp.lt.s32.totalorder %s7022_s23, %s7016_s25 }
 0x7fd   : > { %p7019_p13 = pneg %p7018_p12  ;;  %p7025_p2 = por %p7024_p1, %p7023_p0 }
 0x7ff   : > { %p7026_p3 = pnand %p7025_p2, %p7019_p13 }
 0x866   : > { %v6924_v52 = vpop.permute.xlu0 %6923  ;;  %v6919_v53 = vpop.permute.xlu1 %6918 }
 0x867   : > { %v6921_v19 = vunpack.i.h.bf16 %v6919_v53  ;;  %v6920_v61 = vunpack.i.l.bf16 %v6919_v53  ;;  %v6926_v25 = vunpack.i.h.bf16 %v6924_v52  ;;  %v6925_v24 = vunpack.i.l.bf16 %v6924_v52 }
 0x869   : > { %v5976_v36 = vsel %vm1312_vm2, %v5880_v40, %v6920_v61  ;;  %v5977_v12 = vsel %vm1312_vm2, %v5948_v37, %v6921_v19 }
 0x86a   : > { %v6929_v30 = vpop.permute.xlu1 %6928  ;;  %v5978_v14 = vsel %vm3711_vm5, %v5976_v36, %v6925_v24  ;;  %v5979_v20 = vsel %vm3711_vm5, %v5977_v12, %v6926_v25 }
 0x86b   : > { %v6931_v47 = vunpack.i.h.bf16 %v6929_v30  ;;  %v6930_v26 = vunpack.i.l.bf16 %v6929_v30 }
 0x86d   : > { %v5981_v18 = vsel %vm5980_vm7, %v5978_v14, %v6930_v26  ;;  %v5982_v31 = vsel %vm5980_vm7, %v5979_v20, %v6931_v47 }
 0x86e   : > { %v5983_v23 = vpack.c.bf16 %v5982_v31, %v5981_v18 }
 0x870   : > { %6840 = vmatmul.mubr.msk.bf16.vlgmr.msra.gmra.mxu1 %vm655_vm0, %v5983_v23 }
 0x871   : > { %6859 = vmatprep.mubr.msk.bf16.mxu1 %vm7079_vm1, %v7078_v15  ;;  %6852 = vmatpush3.bf16.msra.mxu1 %v6970_v17 }
 0x872   : > { %6853 = vmatprep.subr.bf16.mxu1 %v7078_v15 }
 0x875   : > { %6854 = vmatpush3.bf16.msra.mxu1 %v6971_v48 }
 0x876   : > { %6855 = vmatprep.subr.bf16.mxu1 %v7078_v15 }
 0x879   : > { %6856 = vmatpush3.bf16.msra.mxu1 %v6972_v49 }
 0x87a   : > { %6857 = vmatprep.subr.bf16.mxu1 %v7078_v15  ;;  %v6477_v15 = vld [vmem:[%s8324_s15] ss:$0 sm:$0xff] }
 0x87d   : > { %6858 = vmatpush3.bf16.msra.mxu1 %v6973_v1 }
 0x930   : > { %v6044_v57 = vpop.f32.mrf.mxu1 }
 0x931   : > { %v6045_v16 = vadd.f32 %v6467_v45, %v6044_v57 }
 0x932   : > { %v6841_v4 = vpop.f32.mrf.mxu1 }
 0x933   : > { %v8207_v21 = vadd.f32 %v7014_v44, %v6045_v16 }
 0x934   : > { %v6047_v42 = vpop.f32.mrf.mxu1 }
 0x935   : > { %v6048_v55 = vadd.f32 %v6467_v45, %v6047_v42  ;;  %v6055_v34 = vsel %vm655_vm0, %v8207_v21, 0.0 }
 0x936   : > { %6056 = vadd.xlane.f32.xlu1 %v6055_v34  ;;  %v6842_v46 = vpop.f32.mrf.mxu1 }
 0x937   : > { %v8212_v56 = vadd.f32 %v7015_v11, %v6048_v55 }
 0x939   : > { %v6058_v33 = vsel %vm655_vm0, %v8212_v56, 0.0 }
 0x93a   : > { %6059 = vadd.xlane.f32.xlu0 %v6058_v33 }
 0x9bf   : > { %v6057_v7 = vpop.xlane.xlu1 %6056 }
 0x9c0   : > { %v6061_v51 = vmul.f32 0.03125, %v6057_v7 }
 0x9c2   : > { %v6063_v63 = vsub.f32 %v8207_v21, %v6061_v51 }
 0x9c3   : > { %v6060_v6 = vpop.xlane.xlu0 %6059 }
 0x9c4   : > { %v6062_v32 = vmul.f32 0.03125, %v6060_v6  ;;  %v6065_v43 = vmul.f32 %v6063_v63, %v6063_v63 }
 0x9c6   : > { %v6064_v39 = vsub.f32 %v8212_v56, %v6062_v32  ;;  %v6067_v41 = vsel %vm655_vm0, %v6065_v43, 0.0 }
 0x9c7   : > { %6068 = vadd.xlane.f32.xlu1 %v6067_v41 }
 0x9c8   : > { %v6066_v3 = vmul.f32 %v6064_v39, %v6064_v39 }
 0x9ca   : > { %v6070_v2 = vsel %vm655_vm0, %v6066_v3, 0.0 }
 0x9cb   : > { %6071 = vadd.xlane.f32.xlu1 %v6070_v2 }
 0xa50   : > { %v6069_v35 = vpop.xlane.xlu1 %6068 }
 0xa51   : > { %v6073_v9 = vmul.f32 0.03125, %v6069_v35 }
 0xa53   : > { %v6075_v22 = vadd.f32 1e-06, %v6073_v9 }
 0xa54   : > { %v6072_v29 = vpop.xlane.xlu1 %6071 }
 0xa55   : > { %7010 = vrsqrt.f32 %v6075_v22  ;;  %v6074_v0 = vmul.f32 0.03125, %v6072_v29 }
 0xa57   : > { %v6076_v40 = vadd.f32 1e-06, %v6074_v0 }
 0xa59   : > { %7012 = vrsqrt.f32 %v6076_v40 }
 0xa62   : > { %v7011_v60 = vpop.eup %7010 }
 0xa63   : > { %v6079_v8 = vmul.f32 %v7011_v60, %v6063_v63 }
 0xa65   : > { %v6087_v10 = vmul.f32 %v6471_v59, %v6079_v8 }
 0xa66   : > { %v7013_v27 = vpop.eup %7012 }
 0xa67   : > { %v6080_v5 = vmul.f32 %v7013_v27, %v6064_v39  ;;  %v6095_v50 = vadd.f32 %v6472_v38, %v6087_v10 }
 0xa69   : > { %v6088_v58 = vmul.f32 %v6471_v59, %v6080_v5 }
 0xa6b   : > { %v6096_v37 = vadd.f32 %v6472_v38, %v6088_v58 }
 0xa6d   : > { %v6097_v62 = vpack.c.bf16 %v6096_v37, %v6095_v50 }
 0xa6f   : > { %6848 = vmatmul.mubr.msk.bf16.vlgmr.msra.gmra.mxu0 %vm655_vm0, %v6097_v62 }
 0xb2f   : > { %v6158_v52 = vpop.f32.mrf.mxu0 }
 0xb30   : > { %v6159_v19 = vadd.f32 %v6473_v13, %v6158_v52 }
 0xb31   : > { %v6849_v53 = vpop.f32.mrf.mxu0 }
 0xb32   : > { %v6165_v36 = vmax.f32 %v6159_v19, 0.0 }
 0xb33   : > { %v6161_v61 = vpop.f32.mrf.mxu0 }
 0xb34   : > { %v6162_v25 = vadd.f32 %v6473_v13, %v6161_v61 }
 0xb35   : > { %v6850_v24 = vpop.f32.mrf.mxu0 }
 0xb36   : > { %v6166_v12 = vmax.f32 %v6162_v25, 0.0 }
 0xb38   : > { %v6167_v30 = vpack.c.bf16 %v6166_v12, %v6165_v36 }
 0xb3a   : > { %6860 = vmatmul.mubr.msk.bf16.vlgmr.msra.gmra.mxu1 %vm6207_vm8, %v6167_v30 }
 0xbfa   : > { %v6245_v47 = vpop.f32.mrf.mxu1 }
 0xbfb   : > { %v6246_v26 = vadd.f32 %v6477_v15, %v6245_v47 }
 0xbfc   : > { %v6861_v14 = vpop.f32.mrf.mxu1 }
 0xbfd   : > { %v6252_v20 = vadd.f32 %v6246_v26, %v8207_v21 }
 0xbfe   : > { %v6248_v18 = vpop.f32.mrf.mxu1 }
 0xbff   : > { %6254 = vst.msk [vmem:[%s559_s30] sm:$0xff] %vm655_vm0, %v6252_v20  ;;  %v6249_v31 = vadd.f32 %v6477_v15, %v6248_v18 }
 0xc00   : > { %v6862_v23 = vpop.f32.mrf.mxu1 }
 0xc01   : > { %v6253_v45 = vadd.f32 %v6249_v31, %v8212_v56 }
 0xc03   : > { %6255 = vst.msk [vmem:[%s559_s30 + $0x8] sm:$0xff] %vm655_vm0, %v6253_v45 }
 0xc04   : > { %7029 = shalt.err (!%p7026_p3)
}
 0xc05   : > { %s7030_s20 = scalar_lea.hbm %s8265_s26, 256  ;;  %s7034_s18 = scalar_lea.hbm %s8325_s16, 512 }
 0xc06   : > { %p7031_p4 = scmp.ne.s32.totalorder %s8265_s26, %s7030_s20  ;;  %p7035_p9 = scmp.lt.s32.totalorder %s8265_s26, %s8325_s16 }
 0xc07   : > { %p7036_p10 = scmp.lt.s32.totalorder %s7034_s18, %s7030_s20 }
 0xc08   : > { %p7032_p7 = pnand %p7031_p4, %p7217_p5 }
 0xc09   : > { %p7037_p11 = por %p7036_p10, %p7035_p9 }
 0xc0a   : > { %p7033_p8 = pneg %p7032_p7 }
 0xc0c   : > { %p7038_p12 = pnand %p7037_p11, %p7033_p8 }
 0xc0e   : > { %7041 = shalt.err (!%p7038_p12)
}
 0xc0f   : > { %s7093_s25 = smov 128  }
 0xc10   : > { %6863 = dma.vmem_to_hbm [thread:$0]  (%p7217_p5), %s8259_s27, 256, %s8265_s26, %s8268_s24, %s7093_s25, %s7093_s25, %s7090_s28  }
 0xc11 PF: > { %s8342_s17 = sld [smem:[#allocation7_spill]] }
 0xc12   : > { %s8343_s23 = sld [smem:[#allocation5_spill]] }
 0xc17   : > { %p6869_p13 = scmp.ge.s32.totalorder %s8342_s17, 2 }
 0xc18   : > { %s6285_s21 = sand.u32 1, %s8343_s23  }
 0xc19   : > { %p6866_p0 = pnand %p6869_p13, %p7221_p6  ;;  %s6286_s20 = scalar_lea.sflag [#allocation3], %s6285_s21 }
 0xc1b   : > { %p6867_p1 = pneg %p6866_p0 }
 0xc1d   : > { %7059 = dma.done.wait (%p6867_p1), %s6286_s20, 256  }
 0xc1e   : > { %7061 = vsyncadd (%p6867_p1), %s6286_s20, 4294967040  ;;  %s8345_s24 = sld [smem:[#allocation8_spill]]  ;;  %s8348_s21 = smov %s7068_s22 }
 0xc1f   : > { %s8346_s0 = sld [smem:[#allocation6_spill]] }
 0xc20   : > { %s8347_s23 = sld [smem:[#allocation9_spill]] }
 0xc24   : > { %p26_p2 = scmp.ge.s32.totalorder %s8345_s24, 4  }
 0xc25   : > { %s8349_s22 = smov %s8346_s0 }
 0xc26   :  { %28 = sbr.rel (!%p26_p2) target bundleno = 5 (0x5), region = 128 }
 0xc2b   :  { %6291 = vsyncpa [#allocation3], 1 }
 0xc2c   :  { %6293 = vsyncpa [#allocation3 + $0x1], 1 }

</bundles_post_ra>
